<compile_context>
chip_gen: v7x
topology: tpu7x:2x2x1
jax: 0.10.0
libtpu: 0.0.40
codegen_flags: <defaults>
</compile_context>

<pallas_src>
import jax
import jax.numpy as jnp
from jax import lax
from jax.experimental import pallas as pl
from jax.experimental.pallas import tpu as pltpu


def _make_kernel(N, H, W, Cp, Q, G, L, MC, eps, fuse_taps):
    """BasicBlock2 kernel over the flat padded frame.

    Frame layout (lane axis): real flattened N*(H+2)*(W+2) padded-grid data
    lives in lanes [G, G + N*(H+2)*(W+2)); the 128-aligned core window
    [G, G + MC) is what conv outputs / BN / the output store operate on.
    """
    cnt = float(N * H * W)                       # number of interior positions
    taps = [(dh - 1) * Q + (dw - 1) for dh in range(3) for dw in range(3)]

    def batchnorm(y, g_ref, b_ref):
        # training-mode BatchNorm2d: per-channel batch stats over the interior
        # positions (y is zero elsewhere), biased variance, affine.  All f32.
        mean = jnp.sum(y, axis=1, keepdims=True) * (1.0 / cnt)
        msq = jnp.sum(y * y, axis=1, keepdims=True) * (1.0 / cnt)
        inv = lax.rsqrt(msq - mean * mean + eps)
        return (y - mean) * (inv * g_ref[...]) + b_ref[...]

    def conv3x3(zf, w_ref, scratch):
        # 3x3 "same" conv over the core window.  zf: (Cp, L) f32 frame whose
        # ring / guard lanes are zero (they supply the conv zero padding).
        # w_ref: (Cp, 9*Cp) bf16, column block k <-> tap k.
        if fuse_taps:
            # Small C: fill the MXU contraction dim — stack the 9 tap views in
            # VMEM and do ONE (Cp, 9Cp) @ (9Cp, MC) single-pass bf16 matmul.
            stack = scratch[0]
            for k, t in enumerate(taps):
                stack[k * Cp:(k + 1) * Cp, :] = zf[:, G + t:G + t + MC]
            return jnp.dot(w_ref[...], stack[...].astype(jnp.bfloat16),
                           preferred_element_type=jnp.float32)
        # C >= 128: contraction already fills an MXU pass; keep a clean
        # dot+add chain (v7x accumulates it in the MRB, no stacking copies).
        acc = None
        for k, t in enumerate(taps):
            p = jnp.dot(w_ref[:, k * Cp:(k + 1) * Cp],
                        zf[:, G + t:G + t + MC].astype(jnp.bfloat16),
                        preferred_element_type=jnp.float32)
            acc = p if acc is None else acc + p
        return acc

    def kernel(x_ref, w1_ref, w2_ref, ws_ref,
               g1_ref, b1_ref, g2_ref, b2_ref, mask_ref,
               out_ref, h1f_ref, *scratch):
        mask = mask_ref[...]                                   # (1, MC) f32
        xf = x_ref[...].astype(jnp.float32)                    # (Cp, L) frame

        # conv1 -> bn1 -> relu; the mask keeps the padding ring / tail at zero
        # so BN stats only see interior positions and conv2 gets free padding.
        y1 = conv3x3(xf, w1_ref, scratch) * mask
        h1 = jnp.maximum(batchnorm(y1, g1_ref, b1_ref), 0.0) * mask   # (Cp, MC)

        # re-embed h1 into a zeroed frame (guard lanes must be finite zeros)
        h1f_ref[...] = jnp.zeros_like(h1f_ref)
        h1f_ref[:, G:G + MC] = h1                              # aligned store

        # conv2 -> bn2
        y2 = batchnorm(conv3x3(h1f_ref[...], w2_ref, scratch) * mask,
                       g2_ref, b2_ref)

        # 1x1 shortcut straight off the (aligned) core window of the input
        sc = jnp.dot(ws_ref[...], xf[:, G:G + MC].astype(jnp.bfloat16),
                     preferred_element_type=jnp.float32)

        # lane-dense, unmasked store; the wrapper slices out the interior
        out_ref[...] = jnp.maximum(y2 + sc, 0.0)

    return kernel


def basic_block2(x_nchw, w1, w2, ws, g1, b1, g2, b2, eps=1e-5):
    N, C, H, W = x_nchw.shape
    P, Q = H + 2, W + 2                       # zero-padded spatial grid
    M = N * P * Q                             # flat padded-grid length
    MC = pl.cdiv(M, 128) * 128                # 128-aligned core / output window
    Cp = pl.cdiv(C, 8) * 8                    # sublane-padded channel count
    G = max(128, pl.cdiv(Q + 1, 128) * 128)   # lane-aligned guard >= max tap shift
    L = pl.cdiv(G + MC + Q + 1, 128) * 128    # full frame length
    fuse_taps = Cp < 128                      # fuse taps when contraction is small

    x = x_nchw.astype(jnp.float32)

    # channels-leading, spatially zero-padded, flattened into the bf16 frame
    xpad = jnp.pad(x, ((0, 0), (0, 0), (1, 1), (1, 1)))                 # (N,C,P,Q)
    xflat = jnp.transpose(xpad, (1, 0, 2, 3)).reshape(C, M)             # (C, M)
    xframe = jnp.pad(xflat, ((0, Cp - C), (G, L - G - M))).astype(jnp.bfloat16)

    # interior mask over the core window (1 exactly at the N*H*W real outputs)
    m3 = jnp.zeros((N, P, Q), jnp.float32).at[:, 1:H + 1, 1:W + 1].set(1.0)
    mask = jnp.pad(m3.reshape(1, M), ((0, 0), (0, MC - M)))             # (1, MC)

    # weights: channel-padded, tap-major rows  w?row[co, k*Cp+ci] = w[co,ci,kh,kw]
    def conv_rows(w):
        wp = jnp.pad(w, ((0, Cp - C), (0, Cp - C), (0, 0), (0, 0)))
        return jnp.transpose(wp, (0, 2, 3, 1)).reshape(Cp, 9 * Cp).astype(jnp.bfloat16)

    w1row, w2row = conv_rows(w1), conv_rows(w2)
    wsrow = jnp.pad(ws[:, :, 0, 0], ((0, Cp - C), (0, Cp - C))).astype(jnp.bfloat16)

    def bn_param(v, fill):
        return jnp.pad(v.astype(jnp.float32), (0, Cp - C),
                       constant_values=fill).reshape(Cp, 1)

    g1r, b1r = bn_param(g1, 1.0), bn_param(b1, 0.0)
    g2r, b2r = bn_param(g2, 1.0), bn_param(b2, 0.0)

    kernel = _make_kernel(N, H, W, Cp, Q, G, L, MC, eps, fuse_taps)

    def full_spec(shape):
        zeros = (0,) * len(shape)
        return pl.BlockSpec(shape, lambda i, _z=zeros: _z)

    scratch_shapes = [pltpu.VMEM((Cp, L), jnp.float32)]        # h1 frame
    if fuse_taps:
        scratch_shapes.append(pltpu.VMEM((9 * Cp, MC), jnp.float32))   # tap stack

    out_core = pl.pallas_call(
        kernel,
        out_shape=jax.ShapeDtypeStruct((Cp, MC), jnp.float32),
        grid=(1,),
        in_specs=[full_spec((Cp, L)), full_spec((Cp, 9 * Cp)),
                  full_spec((Cp, 9 * Cp)), full_spec((Cp, Cp)),
                  full_spec((Cp, 1)), full_spec((Cp, 1)),
                  full_spec((Cp, 1)), full_spec((Cp, 1)),
                  full_spec((1, MC))],
        out_specs=full_spec((Cp, MC)),
        scratch_shapes=scratch_shapes,
        compiler_params=pltpu.CompilerParams(dimension_semantics=("arbitrary",)),
    )(xframe, w1row, w2row, wsrow, g1r, b1r, g2r, b2r, mask)

    # strip channel padding / guards / padding ring, back to NCHW
    out = out_core[:C, :M].reshape(C, N, P, Q)[:, :, 1:H + 1, 1:W + 1]   # (C,N,H,W)
    return jnp.transpose(out, (1, 0, 2, 3))                              # (N,C,H,W)


def ref_block(x, w1, w2, ws, g1, b1, g2, b2, eps=1e-5):
    # pure-JAX f32 reference of the PyTorch forward (training-mode BN)
    def conv(x, w, pad):
        return lax.conv_general_dilated(
            x, w, (1, 1), ((pad, pad), (pad, pad)),
            dimension_numbers=('NCHW', 'OIHW', 'NCHW'),
            precision=lax.Precision.HIGHEST)

    def bn(x, g, b):
        mean = x.mean(axis=(0, 2, 3), keepdims=True)
        var = ((x - mean) ** 2).mean(axis=(0, 2, 3), keepdims=True)
        return ((x - mean) * lax.rsqrt(var + eps) * g.reshape(1, -1, 1, 1)
                + b.reshape(1, -1, 1, 1))

    out = jax.nn.relu(bn(conv(x, w1, 1), g1, b1))
    out = bn(conv(out, w2, 1), g2, b2)
    out = out + conv(x, ws, 0)
    return jax.nn.relu(out)


if __name__ == "__main__":
    N, C, H, W = 2, 4, 16, 16
    key = jax.random.PRNGKey(0)
    ks = jax.random.split(key, 8)

    x = jax.random.normal(ks[0], (N, C, H, W), jnp.float32)
    w1 = 0.1 * jax.random.normal(ks[1], (C, C, 3, 3), jnp.float32)
    w2 = 0.1 * jax.random.normal(ks[2], (C, C, 3, 3), jnp.float32)
    ws = 0.1 * jax.random.normal(ks[3], (C, C, 1, 1), jnp.float32)
    g1 = 1.0 + 0.1 * jax.random.normal(ks[4], (C,), jnp.float32)
    b1 = 0.1 * jax.random.normal(ks[5], (C,), jnp.float32)
    g2 = 1.0 + 0.1 * jax.random.normal(ks[6], (C,), jnp.float32)
    b2 = 0.1 * jax.random.normal(ks[7], (C,), jnp.float32)

    out = jax.block_until_ready(basic_block2(x, w1, w2, ws, g1, b1, g2, b2))
    ref = ref_block(x, w1, w2, ws, g1, b1, g2, b2)
    err = float(jnp.max(jnp.abs(out - ref)))

    assert out.shape == (N, C, H, W), out.shape
    # Tolerance absorbs single-pass bf16-operand MXU rounding against the f32
    # reference (the Precision.HIGHEST multi-pass emulation was dropped per the
    # performance review); typical max |err| here is ~1e-2.
    assert jnp.allclose(out, ref, atol=4e-2, rtol=4e-2), f"max abs err = {err}"
    print("KERNEL_OK")
</pallas_src>

<mosaic_0001>
module attributes {stable_mosaic.version = 11 : i64} {
  func.func @kernel(%arg0: i32, %arg1: memref<8x1024xbf16, #tpu.memory_space<vmem>>, %arg2: memref<8x72xbf16, #tpu.memory_space<vmem>>, %arg3: memref<8x72xbf16, #tpu.memory_space<vmem>>, %arg4: memref<8x8xbf16, #tpu.memory_space<vmem>>, %arg5: memref<8x1xf32, #tpu.memory_space<vmem>>, %arg6: memref<8x1xf32, #tpu.memory_space<vmem>>, %arg7: memref<8x1xf32, #tpu.memory_space<vmem>>, %arg8: memref<8x1xf32, #tpu.memory_space<vmem>>, %arg9: memref<1x768xf32, #tpu.memory_space<vmem>>, %arg10: memref<8x768xf32, #tpu.memory_space<vmem>>, %arg11: memref<8x1024xf32, #tpu.memory_space<vmem>>, %arg12: memref<72x768xf32, #tpu.memory_space<vmem>>) attributes {dimension_semantics = [#tpu.dimension_semantics<arbitrary>], iteration_bounds = array<i64: 1>, scalar_prefetch = 0 : i64, scratch_operands = 2 : i64, tpu.core_type = #tpu.core_type<tc>, window_params = [{pipeline_mode = #tpu.pipeline_mode<synchronous>, transform_indices = @transform_0, window_bounds = array<i64: 8, 1024>}, {pipeline_mode = #tpu.pipeline_mode<synchronous>, transform_indices = @transform_1, window_bounds = array<i64: 8, 72>}, {pipeline_mode = #tpu.pipeline_mode<synchronous>, transform_indices = @transform_2, window_bounds = array<i64: 8, 72>}, {pipeline_mode = #tpu.pipeline_mode<synchronous>, transform_indices = @transform_3, window_bounds = array<i64: 8, 8>}, {pipeline_mode = #tpu.pipeline_mode<synchronous>, transform_indices = @transform_4, window_bounds = array<i64: 8, 1>}, {pipeline_mode = #tpu.pipeline_mode<synchronous>, transform_indices = @transform_5, window_bounds = array<i64: 8, 1>}, {pipeline_mode = #tpu.pipeline_mode<synchronous>, transform_indices = @transform_6, window_bounds = array<i64: 8, 1>}, {pipeline_mode = #tpu.pipeline_mode<synchronous>, transform_indices = @transform_7, window_bounds = array<i64: 8, 1>}, {pipeline_mode = #tpu.pipeline_mode<synchronous>, transform_indices = @transform_8, window_bounds = array<i64: 1, 768>}, {pipeline_mode = #tpu.pipeline_mode<synchronous>, transform_indices = @transform_9, window_bounds = array<i64: 8, 768>}]} {
    %c0 = arith.constant 0 : index
    %c0_0 = arith.constant 0 : index
    %0 = vector.load %arg9[%c0, %c0_0] : memref<1x768xf32, #tpu.memory_space<vmem>>, vector<1x768xf32>
    %c0_1 = arith.constant 0 : index
    %c0_2 = arith.constant 0 : index
    %1 = vector.load %arg1[%c0_1, %c0_2] : memref<8x1024xbf16, #tpu.memory_space<vmem>>, vector<8x1024xbf16>
    %2 = arith.extf %1 : vector<8x1024xbf16> to vector<8x1024xf32>
    %3 = vector.extract_strided_slice %2 {offsets = [0, 109], sizes = [8, 768], strides = [1, 1]} : vector<8x1024xf32> to vector<8x768xf32>
    %c0_3 = arith.constant 0 : index
    %c0_4 = arith.constant 0 : index
    %4 = vector.load %arg12[%c0_3, %c0_4] : memref<72x768xf32, #tpu.memory_space<vmem>>, vector<8x768xf32>
    tpu.vector_store %arg12[%c0_3, %c0_4], %3 {strides = array<i32>} : memref<72x768xf32, #tpu.memory_space<vmem>>, vector<8x768xf32>,
    %5 = vector.extract_strided_slice %2 {offsets = [0, 110], sizes = [8, 768], strides = [1, 1]} : vector<8x1024xf32> to vector<8x768xf32>
    %c8 = arith.constant 8 : index
    %c0_5 = arith.constant 0 : index
    %6 = vector.load %arg12[%c8, %c0_5] : memref<72x768xf32, #tpu.memory_space<vmem>>, vector<8x768xf32>
    tpu.vector_store %arg12[%c8, %c0_5], %5 {strides = array<i32>} : memref<72x768xf32, #tpu.memory_space<vmem>>, vector<8x768xf32>,
    %7 = vector.extract_strided_slice %2 {offsets = [0, 111], sizes = [8, 768], strides = [1, 1]} : vector<8x1024xf32> to vector<8x768xf32>
    %c16 = arith.constant 16 : index
    %c0_6 = arith.constant 0 : index
    %8 = vector.load %arg12[%c16, %c0_6] : memref<72x768xf32, #tpu.memory_space<vmem>>, vector<8x768xf32>
    tpu.vector_store %arg12[%c16, %c0_6], %7 {strides = array<i32>} : memref<72x768xf32, #tpu.memory_space<vmem>>, vector<8x768xf32>,
    %9 = vector.extract_strided_slice %2 {offsets = [0, 127], sizes = [8, 768], strides = [1, 1]} : vector<8x1024xf32> to vector<8x768xf32>
    %c24 = arith.constant 24 : index
    %c0_7 = arith.constant 0 : index
    %10 = vector.load %arg12[%c24, %c0_7] : memref<72x768xf32, #tpu.memory_space<vmem>>, vector<8x768xf32>
    tpu.vector_store %arg12[%c24, %c0_7], %9 {strides = array<i32>} : memref<72x768xf32, #tpu.memory_space<vmem>>, vector<8x768xf32>,
    %11 = vector.extract_strided_slice %2 {offsets = [0, 128], sizes = [8, 768], strides = [1, 1]} : vector<8x1024xf32> to vector<8x768xf32>
    %c32 = arith.constant 32 : index
    %c0_8 = arith.constant 0 : index
    %12 = vector.load %arg12[%c32, %c0_8] : memref<72x768xf32, #tpu.memory_space<vmem>>, vector<8x768xf32>
    tpu.vector_store %arg12[%c32, %c0_8], %11 {strides = array<i32>} : memref<72x768xf32, #tpu.memory_space<vmem>>, vector<8x768xf32>,
    %13 = vector.extract_strided_slice %2 {offsets = [0, 129], sizes = [8, 768], strides = [1, 1]} : vector<8x1024xf32> to vector<8x768xf32>
    %c40 = arith.constant 40 : index
    %c0_9 = arith.constant 0 : index
    %14 = vector.load %arg12[%c40, %c0_9] : memref<72x768xf32, #tpu.memory_space<vmem>>, vector<8x768xf32>
    tpu.vector_store %arg12[%c40, %c0_9], %13 {strides = array<i32>} : memref<72x768xf32, #tpu.memory_space<vmem>>, vector<8x768xf32>,
    %15 = vector.extract_strided_slice %2 {offsets = [0, 145], sizes = [8, 768], strides = [1, 1]} : vector<8x1024xf32> to vector<8x768xf32>
    %c48 = arith.constant 48 : index
    %c0_10 = arith.constant 0 : index
    %16 = vector.load %arg12[%c48, %c0_10] : memref<72x768xf32, #tpu.memory_space<vmem>>, vector<8x768xf32>
    tpu.vector_store %arg12[%c48, %c0_10], %15 {strides = array<i32>} : memref<72x768xf32, #tpu.memory_space<vmem>>, vector<8x768xf32>,
    %17 = vector.extract_strided_slice %2 {offsets = [0, 146], sizes = [8, 768], strides = [1, 1]} : vector<8x1024xf32> to vector<8x768xf32>
    %c56 = arith.constant 56 : index
    %c0_11 = arith.constant 0 : index
    %18 = vector.load %arg12[%c56, %c0_11] : memref<72x768xf32, #tpu.memory_space<vmem>>, vector<8x768xf32>
    tpu.vector_store %arg12[%c56, %c0_11], %17 {strides = array<i32>} : memref<72x768xf32, #tpu.memory_space<vmem>>, vector<8x768xf32>,
    %19 = vector.extract_strided_slice %2 {offsets = [0, 147], sizes = [8, 768], strides = [1, 1]} : vector<8x1024xf32> to vector<8x768xf32>
    %c64 = arith.constant 64 : index
    %c0_12 = arith.constant 0 : index
    %20 = vector.load %arg12[%c64, %c0_12] : memref<72x768xf32, #tpu.memory_space<vmem>>, vector<8x768xf32>
    tpu.vector_store %arg12[%c64, %c0_12], %19 {strides = array<i32>} : memref<72x768xf32, #tpu.memory_space<vmem>>, vector<8x768xf32>,
    %c0_13 = arith.constant 0 : index
    %c0_14 = arith.constant 0 : index
    %21 = vector.load %arg2[%c0_13, %c0_14] : memref<8x72xbf16, #tpu.memory_space<vmem>>, vector<8x72xbf16>
    %c0_15 = arith.constant 0 : index
    %c0_16 = arith.constant 0 : index
    %22 = vector.load %arg12[%c0_15, %c0_16] : memref<72x768xf32, #tpu.memory_space<vmem>>, vector<72x768xf32>
    %23 = arith.truncf %22 : vector<72x768xf32> to vector<72x768xbf16>
    %cst = arith.constant dense<0.000000e+00> : vector<8x768xf32>
    %24 = tpu.matmul %21, %23, %cst {dimension_numbers = #tpu.dot_dimension_numbers<[1], [0], [0], [1], [0, 0, 1, 1], [], []>} : vector<8x72xbf16>, vector<72x768xbf16>, vector<8x768xf32> -> vector<8x768xf32>
    %25 = vector.broadcast %0 : vector<1x768xf32> to vector<8x768xf32>
    %26 = arith.mulf %24, %25 : vector<8x768xf32>
    %cst_17 = arith.constant dense<0.000000e+00> : vector<8xf32>
    %27 = vector.multi_reduction <add>, %26, %cst_17 [1] : vector<8x768xf32> to vector<8xf32>
    %28 = vector.shape_cast %27 : vector<8xf32> to vector<8x1xf32>
    %cst_18 = arith.constant 0.001953125 : f32
    %29 = vector.broadcast %cst_18 : f32 to vector<8x1xf32>
    %30 = arith.mulf %28, %29 : vector<8x1xf32>
    %31 = arith.mulf %26, %26 : vector<8x768xf32>
    %cst_19 = arith.constant dense<0.000000e+00> : vector<8xf32>
    %32 = vector.multi_reduction <add>, %31, %cst_19 [1] : vector<8x768xf32> to vector<8xf32>
    %33 = vector.shape_cast %32 : vector<8xf32> to vector<8x1xf32>
    %cst_20 = arith.constant 0.001953125 : f32
    %34 = vector.broadcast %cst_20 : f32 to vector<8x1xf32>
    %35 = arith.mulf %33, %34 : vector<8x1xf32>
    %36 = arith.mulf %30, %30 : vector<8x1xf32>
    %37 = arith.subf %35, %36 : vector<8x1xf32>
    %cst_21 = arith.constant 9.99999974E-6 : f32
    %38 = vector.broadcast %cst_21 : f32 to vector<8x1xf32>
    %39 = arith.addf %37, %38 : vector<8x1xf32>
    %40 = math.rsqrt %39 : vector<8x1xf32>
    %41 = vector.broadcast %30 : vector<8x1xf32> to vector<8x768xf32>
    %42 = arith.subf %26, %41 : vector<8x768xf32>
    %c0_22 = arith.constant 0 : index
    %c0_23 = arith.constant 0 : index
    %43 = vector.load %arg5[%c0_22, %c0_23] : memref<8x1xf32, #tpu.memory_space<vmem>>, vector<8x1xf32>
    %44 = arith.mulf %40, %43 : vector<8x1xf32>
    %45 = vector.broadcast %44 : vector<8x1xf32> to vector<8x768xf32>
    %46 = arith.mulf %42, %45 : vector<8x768xf32>
    %c0_24 = arith.constant 0 : index
    %c0_25 = arith.constant 0 : index
    %47 = vector.load %arg6[%c0_24, %c0_25] : memref<8x1xf32, #tpu.memory_space<vmem>>, vector<8x1xf32>
    %48 = vector.broadcast %47 : vector<8x1xf32> to vector<8x768xf32>
    %49 = arith.addf %46, %48 : vector<8x768xf32>
    %cst_26 = arith.constant 0.000000e+00 : f32
    %50 = vector.broadcast %cst_26 : f32 to vector<8x768xf32>
    %51 = arith.maximumf %49, %50 : vector<8x768xf32>
    %52 = vector.broadcast %0 : vector<1x768xf32> to vector<8x768xf32>
    %53 = arith.mulf %51, %52 : vector<8x768xf32>
    %cst_27 = arith.constant 0.000000e+00 : f32
    %54 = vector.broadcast %cst_27 : f32 to vector<8x1024xf32>
    %c0_28 = arith.constant 0 : index
    %c0_29 = arith.constant 0 : index
    %55 = vector.load %arg11[%c0_28, %c0_29] : memref<8x1024xf32, #tpu.memory_space<vmem>>, vector<8x1024xf32>
    tpu.vector_store %arg11[%c0_28, %c0_29], %54 {strides = array<i32>} : memref<8x1024xf32, #tpu.memory_space<vmem>>, vector<8x1024xf32>,
    %c0_30 = arith.constant 0 : index
    %c128 = arith.constant 128 : index
    %56 = vector.load %arg11[%c0_30, %c128] : memref<8x1024xf32, #tpu.memory_space<vmem>>, vector<8x768xf32>
    tpu.vector_store %arg11[%c0_30, %c128], %53 {strides = array<i32>} : memref<8x1024xf32, #tpu.memory_space<vmem>>, vector<8x768xf32>,
    %c0_31 = arith.constant 0 : index
    %c0_32 = arith.constant 0 : index
    %57 = vector.load %arg11[%c0_31, %c0_32] : memref<8x1024xf32, #tpu.memory_space<vmem>>, vector<8x1024xf32>
    %58 = vector.extract_strided_slice %57 {offsets = [0, 109], sizes = [8, 768], strides = [1, 1]} : vector<8x1024xf32> to vector<8x768xf32>
    %c0_33 = arith.constant 0 : index
    %c0_34 = arith.constant 0 : index
    %59 = vector.load %arg12[%c0_33, %c0_34] : memref<72x768xf32, #tpu.memory_space<vmem>>, vector<8x768xf32>
    tpu.vector_store %arg12[%c0_33, %c0_34], %58 {strides = array<i32>} : memref<72x768xf32, #tpu.memory_space<vmem>>, vector<8x768xf32>,
    %60 = vector.extract_strided_slice %57 {offsets = [0, 110], sizes = [8, 768], strides = [1, 1]} : vector<8x1024xf32> to vector<8x768xf32>
    %c8_35 = arith.constant 8 : index
    %c0_36 = arith.constant 0 : index
    %61 = vector.load %arg12[%c8_35, %c0_36] : memref<72x768xf32, #tpu.memory_space<vmem>>, vector<8x768xf32>
    tpu.vector_store %arg12[%c8_35, %c0_36], %60 {strides = array<i32>} : memref<72x768xf32, #tpu.memory_space<vmem>>, vector<8x768xf32>,
    %62 = vector.extract_strided_slice %57 {offsets = [0, 111], sizes = [8, 768], strides = [1, 1]} : vector<8x1024xf32> to vector<8x768xf32>
    %c16_37 = arith.constant 16 : index
    %c0_38 = arith.constant 0 : index
    %63 = vector.load %arg12[%c16_37, %c0_38] : memref<72x768xf32, #tpu.memory_space<vmem>>, vector<8x768xf32>
    tpu.vector_store %arg12[%c16_37, %c0_38], %62 {strides = array<i32>} : memref<72x768xf32, #tpu.memory_space<vmem>>, vector<8x768xf32>,
    %64 = vector.extract_strided_slice %57 {offsets = [0, 127], sizes = [8, 768], strides = [1, 1]} : vector<8x1024xf32> to vector<8x768xf32>
    %c24_39 = arith.constant 24 : index
    %c0_40 = arith.constant 0 : index
    %65 = vector.load %arg12[%c24_39, %c0_40] : memref<72x768xf32, #tpu.memory_space<vmem>>, vector<8x768xf32>
    tpu.vector_store %arg12[%c24_39, %c0_40], %64 {strides = array<i32>} : memref<72x768xf32, #tpu.memory_space<vmem>>, vector<8x768xf32>,
    %66 = vector.extract_strided_slice %57 {offsets = [0, 128], sizes = [8, 768], strides = [1, 1]} : vector<8x1024xf32> to vector<8x768xf32>
    %c32_41 = arith.constant 32 : index
    %c0_42 = arith.constant 0 : index
    %67 = vector.load %arg12[%c32_41, %c0_42] : memref<72x768xf32, #tpu.memory_space<vmem>>, vector<8x768xf32>
    tpu.vector_store %arg12[%c32_41, %c0_42], %66 {strides = array<i32>} : memref<72x768xf32, #tpu.memory_space<vmem>>, vector<8x768xf32>,
    %68 = vector.extract_strided_slice %57 {offsets = [0, 129], sizes = [8, 768], strides = [1, 1]} : vector<8x1024xf32> to vector<8x768xf32>
    %c40_43 = arith.constant 40 : index
    %c0_44 = arith.constant 0 : index
    %69 = vector.load %arg12[%c40_43, %c0_44] : memref<72x768xf32, #tpu.memory_space<vmem>>, vector<8x768xf32>
    tpu.vector_store %arg12[%c40_43, %c0_44], %68 {strides = array<i32>} : memref<72x768xf32, #tpu.memory_space<vmem>>, vector<8x768xf32>,
    %70 = vector.extract_strided_slice %57 {offsets = [0, 145], sizes = [8, 768], strides = [1, 1]} : vector<8x1024xf32> to vector<8x768xf32>
    %c48_45 = arith.constant 48 : index
    %c0_46 = arith.constant 0 : index
    %71 = vector.load %arg12[%c48_45, %c0_46] : memref<72x768xf32, #tpu.memory_space<vmem>>, vector<8x768xf32>
    tpu.vector_store %arg12[%c48_45, %c0_46], %70 {strides = array<i32>} : memref<72x768xf32, #tpu.memory_space<vmem>>, vector<8x768xf32>,
    %72 = vector.extract_strided_slice %57 {offsets = [0, 146], sizes = [8, 768], strides = [1, 1]} : vector<8x1024xf32> to vector<8x768xf32>
    %c56_47 = arith.constant 56 : index
    %c0_48 = arith.constant 0 : index
    %73 = vector.load %arg12[%c56_47, %c0_48] : memref<72x768xf32, #tpu.memory_space<vmem>>, vector<8x768xf32>
    tpu.vector_store %arg12[%c56_47, %c0_48], %72 {strides = array<i32>} : memref<72x768xf32, #tpu.memory_space<vmem>>, vector<8x768xf32>,
    %74 = vector.extract_strided_slice %57 {offsets = [0, 147], sizes = [8, 768], strides = [1, 1]} : vector<8x1024xf32> to vector<8x768xf32>
    %c64_49 = arith.constant 64 : index
    %c0_50 = arith.constant 0 : index
    %75 = vector.load %arg12[%c64_49, %c0_50] : memref<72x768xf32, #tpu.memory_space<vmem>>, vector<8x768xf32>
    tpu.vector_store %arg12[%c64_49, %c0_50], %74 {strides = array<i32>} : memref<72x768xf32, #tpu.memory_space<vmem>>, vector<8x768xf32>,
    %c0_51 = arith.constant 0 : index
    %c0_52 = arith.constant 0 : index
    %76 = vector.load %arg3[%c0_51, %c0_52] : memref<8x72xbf16, #tpu.memory_space<vmem>>, vector<8x72xbf16>
    %c0_53 = arith.constant 0 : index
    %c0_54 = arith.constant 0 : index
    %77 = vector.load %arg12[%c0_53, %c0_54] : memref<72x768xf32, #tpu.memory_space<vmem>>, vector<72x768xf32>
    %78 = arith.truncf %77 : vector<72x768xf32> to vector<72x768xbf16>
    %cst_55 = arith.constant dense<0.000000e+00> : vector<8x768xf32>
    %79 = tpu.matmul %76, %78, %cst_55 {dimension_numbers = #tpu.dot_dimension_numbers<[1], [0], [0], [1], [0, 0, 1, 1], [], []>} : vector<8x72xbf16>, vector<72x768xbf16>, vector<8x768xf32> -> vector<8x768xf32>
    %80 = vector.broadcast %0 : vector<1x768xf32> to vector<8x768xf32>
    %81 = arith.mulf %79, %80 : vector<8x768xf32>
    %cst_56 = arith.constant dense<0.000000e+00> : vector<8xf32>
    %82 = vector.multi_reduction <add>, %81, %cst_56 [1] : vector<8x768xf32> to vector<8xf32>
    %83 = vector.shape_cast %82 : vector<8xf32> to vector<8x1xf32>
    %cst_57 = arith.constant 0.001953125 : f32
    %84 = vector.broadcast %cst_57 : f32 to vector<8x1xf32>
    %85 = arith.mulf %83, %84 : vector<8x1xf32>
    %86 = arith.mulf %81, %81 : vector<8x768xf32>
    %cst_58 = arith.constant dense<0.000000e+00> : vector<8xf32>
    %87 = vector.multi_reduction <add>, %86, %cst_58 [1] : vector<8x768xf32> to vector<8xf32>
    %88 = vector.shape_cast %87 : vector<8xf32> to vector<8x1xf32>
    %cst_59 = arith.constant 0.001953125 : f32
    %89 = vector.broadcast %cst_59 : f32 to vector<8x1xf32>
    %90 = arith.mulf %88, %89 : vector<8x1xf32>
    %91 = arith.mulf %85, %85 : vector<8x1xf32>
    %92 = arith.subf %90, %91 : vector<8x1xf32>
    %cst_60 = arith.constant 9.99999974E-6 : f32
    %93 = vector.broadcast %cst_60 : f32 to vector<8x1xf32>
    %94 = arith.addf %92, %93 : vector<8x1xf32>
    %95 = math.rsqrt %94 : vector<8x1xf32>
    %96 = vector.broadcast %85 : vector<8x1xf32> to vector<8x768xf32>
    %97 = arith.subf %81, %96 : vector<8x768xf32>
    %c0_61 = arith.constant 0 : index
    %c0_62 = arith.constant 0 : index
    %98 = vector.load %arg7[%c0_61, %c0_62] : memref<8x1xf32, #tpu.memory_space<vmem>>, vector<8x1xf32>
    %99 = arith.mulf %95, %98 : vector<8x1xf32>
    %100 = vector.broadcast %99 : vector<8x1xf32> to vector<8x768xf32>
    %101 = arith.mulf %97, %100 : vector<8x768xf32>
    %c0_63 = arith.constant 0 : index
    %c0_64 = arith.constant 0 : index
    %102 = vector.load %arg8[%c0_63, %c0_64] : memref<8x1xf32, #tpu.memory_space<vmem>>, vector<8x1xf32>
    %103 = vector.broadcast %102 : vector<8x1xf32> to vector<8x768xf32>
    %104 = arith.addf %101, %103 : vector<8x768xf32>
    %c0_65 = arith.constant 0 : index
    %c0_66 = arith.constant 0 : index
    %105 = vector.load %arg4[%c0_65, %c0_66] : memref<8x8xbf16, #tpu.memory_space<vmem>>, vector<8x8xbf16>
    %106 = vector.extract_strided_slice %2 {offsets = [0, 128], sizes = [8, 768], strides = [1, 1]} : vector<8x1024xf32> to vector<8x768xf32>
    %107 = arith.truncf %106 : vector<8x768xf32> to vector<8x768xbf16>
    %cst_67 = arith.constant dense<0.000000e+00> : vector<8x768xf32>
    %108 = tpu.matmul %105, %107, %cst_67 {dimension_numbers = #tpu.dot_dimension_numbers<[1], [0], [0], [1], [0, 0, 1, 1], [], []>} : vector<8x8xbf16>, vector<8x768xbf16>, vector<8x768xf32> -> vector<8x768xf32>
    %109 = arith.addf %104, %108 : vector<8x768xf32>
    %cst_68 = arith.constant 0.000000e+00 : f32
    %110 = vector.broadcast %cst_68 : f32 to vector<8x768xf32>
    %111 = arith.maximumf %109, %110 : vector<8x768xf32>
    %c0_69 = arith.constant 0 : index
    %c0_70 = arith.constant 0 : index
    %112 = vector.load %arg10[%c0_69, %c0_70] : memref<8x768xf32, #tpu.memory_space<vmem>>, vector<8x768xf32>
    tpu.vector_store %arg10[%c0_69, %c0_70], %111 {strides = array<i32>} : memref<8x768xf32, #tpu.memory_space<vmem>>, vector<8x768xf32>,
    return
  }
  func.func @transform_0(%arg0: i32) -> (i32, i32) {
    %c0_i32 = arith.constant 0 : i32
    %c0_i32_0 = arith.constant 0 : i32
    %c0_i32_1 = arith.constant 0 : i32
    return %c0_i32, %c0_i32_0 : i32, i32
  }
  func.func @transform_1(%arg0: i32) -> (i32, i32) {
    %c0_i32 = arith.constant 0 : i32
    %c0_i32_0 = arith.constant 0 : i32
    %c0_i32_1 = arith.constant 0 : i32
    return %c0_i32, %c0_i32_0 : i32, i32
  }
  func.func @transform_2(%arg0: i32) -> (i32, i32) {
    %c0_i32 = arith.constant 0 : i32
    %c0_i32_0 = arith.constant 0 : i32
    %c0_i32_1 = arith.constant 0 : i32
    return %c0_i32, %c0_i32_0 : i32, i32
  }
  func.func @transform_3(%arg0: i32) -> (i32, i32) {
    %c0_i32 = arith.constant 0 : i32
    %c0_i32_0 = arith.constant 0 : i32
    %c0_i32_1 = arith.constant 0 : i32
    return %c0_i32, %c0_i32_0 : i32, i32
  }
  func.func @transform_4(%arg0: i32) -> (i32, i32) {
    %c0_i32 = arith.constant 0 : i32
    %c0_i32_0 = arith.constant 0 : i32
    %c0_i32_1 = arith.constant 0 : i32
    return %c0_i32, %c0_i32_0 : i32, i32
  }
  func.func @transform_5(%arg0: i32) -> (i32, i32) {
    %c0_i32 = arith.constant 0 : i32
    %c0_i32_0 = arith.constant 0 : i32
    %c0_i32_1 = arith.constant 0 : i32
    return %c0_i32, %c0_i32_0 : i32, i32
  }
  func.func @transform_6(%arg0: i32) -> (i32, i32) {
    %c0_i32 = arith.constant 0 : i32
    %c0_i32_0 = arith.constant 0 : i32
    %c0_i32_1 = arith.constant 0 : i32
    return %c0_i32, %c0_i32_0 : i32, i32
  }
  func.func @transform_7(%arg0: i32) -> (i32, i32) {
    %c0_i32 = arith.constant 0 : i32
    %c0_i32_0 = arith.constant 0 : i32
    %c0_i32_1 = arith.constant 0 : i32
    return %c0_i32, %c0_i32_0 : i32, i32
  }
  func.func @transform_8(%arg0: i32) -> (i32, i32) {
    %c0_i32 = arith.constant 0 : i32
    %c0_i32_0 = arith.constant 0 : i32
    %c0_i32_1 = arith.constant 0 : i32
    return %c0_i32, %c0_i32_0 : i32, i32
  }
  func.func @transform_9(%arg0: i32) -> (i32, i32) {
    %c0_i32 = arith.constant 0 : i32
    %c0_i32_0 = arith.constant 0 : i32
    %c0_i32_1 = arith.constant 0 : i32
    return %c0_i32, %c0_i32_0 : i32, i32
  }
}

</mosaic_0001>

<bundles_post_ra>
// kernel: tpu_custom_call.1
= control target key start
LH: loop header
LB: loop body
LE: loop exit
PB: predicated region body
PF: predicated region fallthrough
CT: control target
= control target key end

     0   :  { %14 = vsyncpa [#allocation5], 0  ;;  %s2448_s0 = inlined_call_operand.vmem [shape: bf16[8,1024], index: 0, kind: input, shape index: {}]   ;;  %s2449_s1 = inlined_call_operand.hbm [shape: bf16[8,72], index: 1, kind: input, shape index: {}]   ;;  %s2450_s2 = inlined_call_operand.vmem [shape: bf16[8,72], index: 2, kind: input, shape index: {}]   ;;  %s2451_s3 = inlined_call_operand.vmem [shape: bf16[8,8], index: 3, kind: input, shape index: {}]   ;;  %s2452_s4 = inlined_call_operand.vmem [shape: f32[8,1], index: 4, kind: input, shape index: {}]   ;;  %s2453_s5 = inlined_call_operand.vmem [shape: f32[8,1], index: 5, kind: input, shape index: {}]   ;;  %s2454_s6 = inlined_call_operand.vmem [shape: f32[8,1], index: 6, kind: input, shape index: {}]   ;;  %s2455_s7 = inlined_call_operand.vmem [shape: f32[8,1], index: 7, kind: input, shape index: {}]   ;;  %s2456_s8 = inlined_call_operand.vmem [shape: f32[1,768], index: 8, kind: input, shape index: {}]   ;;  %s2457_s9 = inlined_call_operand.hbm [shape: f32[8,768], index: 9, kind: output, shape index: {}]  }
   0x1   :  { %15 = vsyncpa [#allocation6], 0  ;;  %s1783_s30 = smov [#allocation4]   ;;  %s1735_s13 = scalar_lea.hbm %s2449_s1, 64 }
   0x2   :  { %s24_s10 = sshll.u32 %s1783_s30, 4  ;;  %p1736_p0 = scmp.ne.s32.totalorder %s2449_s1, %s1735_s13  ;;  %s25_s10 = int_to_ptr.vmem [resolvable:$true] %s24_s10 }
   0x3   :  { %p1739_p1 = scmp.lt.u32.totalorder %s1735_s13, %s2449_s1 }
   0x5   :  { %p1741_p2 = pnand %p1739_p1, %p1736_p0 }
   0x7   :  { %1744 = shalt.err (!%p1741_p2)
}
   0x8   :  { %s1745_s18 = scalar_lea.vmem %s25_s10, 64  ;;  %p1750_p4 = scmp.lt.s32.totalorder %s25_s10, %s25_s10 }
   0x9   :  { %p1746_p3 = scmp.ne.s32.totalorder %s25_s10, %s1745_s18  ;;  %p1751_p5 = scmp.lt.s32.totalorder %s1745_s18, %s1745_s18 }
   0xb   :  { %p1752_p6 = por %p1751_p5, %p1750_p4 }
   0xd   :  { %p1753_p7 = pnand %p1752_p6, %p1746_p3 }
   0xf   :  { %1756 = shalt.err (!%p1753_p7)
}
  0x10   :  { %27 = dma.hbm_to_vmem [thread:$0]  %s2449_s1, 64, %s25_s10, [#allocation5]  }
  0x11   :  { %1779 = dma.done.wait [#allocation5], 64  }
  0x12   :  { %1780 = vsyncadd [#allocation5], 4294967232  ;;  %v47_v0 = vld [vmem:[%s2448_s0] sm:$0xff]  ;;  %v48_v1 = vld [vmem:[%s2448_s0 + $0x8] sm:$0xff]  ;;  %s1784_s1 = smov 19   ;;  %s1785_s25 = smov 18  }
  0x13   :  { %v1863_v2 = vunpack.c.h.bf16 %v47_v0  ;;  %v1865_v3 = vunpack.c.l.bf16 %v48_v1  ;;  %v51_v4 = vunpack.c.l.bf16 %v47_v0  ;;  %v1867_v5 = vunpack.c.h.bf16 %v48_v1  ;;  %v49_v8 = vld [vmem:[%s2448_s0 + $0x10] sm:$0xff]  ;;  %s1786_s28 = smov 17   ;;  %s1787_s29 = smov 1   ;;  %v50_v14 = vld [vmem:[%s2448_s0 + $0x18] sm:$0xff] }
  0x14   :  { %v1881_v9 = vunpack.c.l.bf16 %v49_v8  ;;  %s1788_s30 = smov 127   ;;  %s1789_s10 = smov 111   ;;  %v1893_v12 = vunpack.c.h.bf16 %v49_v8  ;;  %v1791_v15 = vmov 0   ;;  %v1912_v16 = vunpack.c.l.bf16 %v50_v14 }
  0x15   :  { %v1479_v6 = vpack.i.bf16 %v1865_v3, %v1863_v2  ;;  %v1489_v7 = vpack.i.bf16 %v1867_v5, %v51_v4  ;;  %v1519_v10 = vpack.i.bf16 %v1867_v5, %v1865_v3  ;;  %s1790_s11 = smov 110   ;;  %477 = vmatprep.mubr.bf16.mxu0 %v1791_v15  ;;  %518 = vmatprep.mubr.bf16.mxu1 %v1791_v15  ;;  %s1792_s14 = smov 109   ;;  %v58_v18 = vunpack.c.h.bf16 %v50_v14 }
  0x16   :  { %v1524_v11 = vpack.i.bf16 %v1881_v9, %v1863_v2  ;;  %v1544_v13 = vpack.i.bf16 %v1893_v12, %v1881_v9  ;;  %1599 = vset.pattern.permute.xlu0 %v1791_v15  ;;  %1600 = vset.pattern.permute.xlu1 %v1791_v15  ;;  %v1569_v17 = vpack.i.bf16 %v1912_v16, %v1893_v12  ;;  %vm80_vm0 = vcmask 154624  }
  0x17   :  { %1480 = vrot.lane.b32.xlu0 %v1479_v6, %s1784_s1  ;;  %1490 = vrot.lane.b32.xlu1 %v1489_v7, %s1784_s1  ;;  %v1584_v19 = vpack.i.bf16 %v58_v18, %v1912_v16  ;;  %vm113_vm1 = vcmask 146432   ;;  %vm146_vm2 = vcmask 138240   ;;  %vm179_vm3 = vcmask 7168  }
  0x18   :  { %vm219_vm4 = vcmask 1039360   ;;  %vm252_vm5 = vcmask 908288   ;;  %vm285_vm6 = vcmask 900096   ;;  %vm318_vm7 = vcmask 891904  }
  0x19   :  { %vm426_vm8 = vcmask 1043456   ;;  %vm422_vm9 = vcmask 588800   ;;  %vm1265_vm10 = vcmask 64512  }
  0x1b   :  { %1485 = vrot.lane.b32.xlu0 %v1479_v6, %s1785_s25  ;;  %1495 = vrot.lane.b32.xlu1 %v1489_v7, %s1785_s25 }
  0x1f   :  { %1500 = vrot.lane.b32.xlu0 %v1479_v6, %s1786_s28  ;;  %1505 = vrot.lane.b32.xlu1 %v1479_v6, %s1787_s29 }
  0x23   :  { %1510 = vrot.lane.b32.xlu0 %v1489_v7, %s1786_s28  ;;  %1515 = vrot.lane.b32.xlu1 %v1489_v7, %s1787_s29 }
  0x27   :  { %1520 = vrot.lane.b32.xlu0 %v1519_v10, %s1788_s30  ;;  %1525 = vrot.lane.b32.xlu1 %v1524_v11, %s1788_s30 }
  0x2b   :  { %1530 = vrot.lane.b32.xlu0 %v1519_v10, %s1789_s10  ;;  %1535 = vrot.lane.b32.xlu1 %v1519_v10, %s1790_s11 }
  0x2f   :  { %1540 = vrot.lane.b32.xlu0 %v1524_v11, %s1789_s10  ;;  %271 = vrot.lane.b32.xlu1 %v1863_v2, %s1790_s11 }
  0x33   :  { %1545 = vrot.lane.b32.xlu0 %v1544_v13, %s1784_s1  ;;  %1550 = vrot.lane.b32.xlu1 %v1544_v13, %s1785_s25 }
  0x37   :  { %1555 = vrot.lane.b32.xlu0 %v1479_v6, %s1792_s14  ;;  %308 = vrot.lane.b32.xlu1 %v1867_v5, %s1792_s14 }
  0x3b   :  { %78 = vrot.lane.b32.xlu0 %v1912_v16, %s1784_s1  ;;  %111 = vrot.lane.b32.xlu1 %v1912_v16, %s1785_s25 }
  0x3f   :  { %1560 = vrot.lane.b32.xlu0 %v1544_v13, %s1786_s28  ;;  %1565 = vrot.lane.b32.xlu1 %v1544_v13, %s1787_s29 }
  0x43   :  { %144 = vrot.lane.b32.xlu0 %v1912_v16, %s1786_s28  ;;  %177 = vrot.lane.b32.xlu1 %v1912_v16, %s1787_s29 }
  0x47   :  { %1570 = vrot.lane.b32.xlu0 %v1569_v17, %s1788_s30  ;;  %217 = vrot.lane.b32.xlu1 %v58_v18, %s1788_s30 }
  0x4b   :  { %1575 = vrot.lane.b32.xlu0 %v1569_v17, %s1789_s10  ;;  %1580 = vrot.lane.b32.xlu1 %v1544_v13, %s1790_s11 }
  0x4f   :  { %250 = vrot.lane.b32.xlu0 %v58_v18, %s1789_s10  ;;  %1585 = vrot.lane.b32.xlu1 %v1584_v19, %s1790_s11 }
  0x53   :  { %1590 = vrot.lane.b32.xlu0 %v1544_v13, %s1792_s14  ;;  %1595 = vrot.lane.b32.xlu1 %v1584_v19, %s1792_s14 }
  0x89   :  { %v1935_v20 = vpop.permute.xlu0 %1480  ;;  %v1937_v21 = vpop.permute.xlu1 %1490 }
  0x8a   :  { %v1483_v22 = vunpack.i.h.bf16 %v1935_v20  ;;  %v1482_v23 = vunpack.i.l.bf16 %v1935_v20  ;;  %v1492_v24 = vunpack.i.l.bf16 %v1937_v21  ;;  %v1493_v14 = vunpack.i.h.bf16 %v1937_v21 }
  0x8c   :  { %v82_v30 = vsel %vm80_vm0, %v1482_v23, %v1483_v22  ;;  %v81_v32 = vsel %vm80_vm0, %v1492_v24, %v1482_v23  ;;  %v83_v21 = vsel %vm80_vm0, %v1483_v22, %v1493_v14 }
  0x8d   :  { %v1942_v25 = vpop.permute.xlu0 %1485  ;;  %v1944_v26 = vpop.permute.xlu1 %1495 }
  0x8e   :  { %v1488_v27 = vunpack.i.h.bf16 %v1942_v25  ;;  %v1487_v28 = vunpack.i.l.bf16 %v1942_v25  ;;  %v1497_v29 = vunpack.i.l.bf16 %v1944_v26  ;;  %v1498_v10 = vunpack.i.h.bf16 %v1944_v26 }
  0x90   :  { %v115_v31 = vsel %vm113_vm1, %v1487_v28, %v1488_v27  ;;  %v114_v33 = vsel %vm113_vm1, %v1497_v29, %v1487_v28  ;;  %v116_v29 = vsel %vm113_vm1, %v1488_v27, %v1498_v10 }
  0x91   :  { %v1957_v34 = vpop.permute.xlu0 %1500  ;;  %v1959_v35 = vpop.permute.xlu1 %1505  ;;  %v393_v36 = vpack.c.bf16 %v115_v31, %v82_v30  ;;  %v392_v37 = vpack.c.bf16 %v114_v33, %v81_v32 }
  0x92   :  { %v1503_v38 = vunpack.i.h.bf16 %v1957_v34  ;;  %v1502_v39 = vunpack.i.l.bf16 %v1957_v34  ;;  %v1508_v40 = vunpack.i.h.bf16 %v1959_v35  ;;  %v1507_v41 = vunpack.i.l.bf16 %v1959_v35 }
  0x93   :  { %445 = vmatprep.subr.bf16.mxu0 %v393_v36  ;;  %v394_v36 = vpack.c.bf16 %v116_v29, %v83_v21 }
  0x94   :  { %446 = vmatpush1.bf16.msra.mxu0 %v392_v37  ;;  %v148_v42 = vsel %vm146_vm2, %v1502_v39, %v1503_v38  ;;  %v181_v43 = vsel %vm179_vm3, %v1507_v41, %v1508_v40 }
  0x95   :  { %v1971_v44 = vpop.permute.xlu0 %1510  ;;  %v1973_v45 = vpop.permute.xlu1 %1515  ;;  %v399_v46 = vpack.c.bf16 %v181_v43, %v148_v42 }
  0x96   :  { %v1512_v47 = vunpack.i.l.bf16 %v1971_v44  ;;  %v1517_v48 = vunpack.i.l.bf16 %v1973_v45 }
  0x97   :  { %447 = vmatprep.subr.bf16.mxu0 %v399_v46 }
  0x98   :  { %v147_v49 = vsel %vm146_vm2, %v1512_v47, %v1502_v39  ;;  %v180_v50 = vsel %vm179_vm3, %v1517_v48, %v1507_v41 }
  0x99   :  { %v1979_v51 = vpop.permute.xlu0 %1520  ;;  %v1981_v52 = vpop.permute.xlu1 %1525  ;;  %v398_v53 = vpack.c.bf16 %v180_v50, %v147_v49 }
  0x9a   :  { %v1523_v54 = vunpack.i.h.bf16 %v1979_v51  ;;  %v1522_v55 = vunpack.i.l.bf16 %v1979_v51  ;;  %v1527_v56 = vunpack.i.l.bf16 %v1981_v52 }
  0x9b   :  { %448 = vmatpush1.bf16.msra.mxu0 %v398_v53  ;;  %v1513_v53 = vunpack.i.h.bf16 %v1971_v44 }
  0x9c   :  { %v221_v57 = vsel %vm219_vm4, %v1522_v55, %v1523_v54  ;;  %v220_v58 = vsel %vm219_vm4, %v1527_v56, %v1522_v55  ;;  %v1518_v55 = vunpack.i.h.bf16 %v1973_v45 }
  0x9d   :  { %v1990_v59 = vpop.permute.xlu0 %1530  ;;  %v1992_v60 = vpop.permute.xlu1 %1535  ;;  %v405_v61 = vpack.c.bf16 %v221_v57, %v1865_v3  ;;  %v404_v62 = vpack.c.bf16 %v220_v58, %v1863_v2  ;;  %v2034_v58 = vld [vmem:[#allocation4] sm:$0xf]  ;;  %v149_v44 = vsel %vm146_vm2, %v1503_v38, %v1513_v53 }
  0x9e   :  { %v1533_v63 = vunpack.i.h.bf16 %v1990_v59  ;;  %v1532_v0 = vunpack.i.l.bf16 %v1990_v59  ;;  %v1538_v1 = vunpack.i.h.bf16 %v1992_v60  ;;  %v1537_v4 = vunpack.i.l.bf16 %v1992_v60 }
  0x9f   :  { %449 = vmatprep.subr.bf16.mxu0 %v405_v61  ;;  %v182_v45 = vsel %vm179_vm3, %v1508_v40, %v1518_v55  ;;  %v1528_v40 = vunpack.i.h.bf16 %v1981_v52 }
  0xa0   :  { %450 = vmatpush1.bf16.msra.mxu0 %v404_v62  ;;  %v254_v6 = vsel %vm252_vm5, %v1532_v0, %v1533_v63  ;;  %v287_v2 = vsel %vm285_vm6, %v1537_v4, %v1538_v1  ;;  %v400_v38 = vpack.c.bf16 %v182_v45, %v149_v44 }
  0xa1   :  { %v2006_v3 = vpop.permute.xlu0 %1540  ;;  %v272_v7 = vpop.permute.xlu1 %271  ;;  %v411_v8 = vpack.c.bf16 %v287_v2, %v254_v6 }
  0xa2   :  { %v1542_v11 = vunpack.i.l.bf16 %v2006_v3  ;;  %v286_v13 = vsel %vm285_vm6, %v272_v7, %v1537_v4 }
  0xa3   :  { %451 = vmatprep.subr.bf16.mxu0 %v411_v8 }
  0xa4   :  { %v253_v17 = vsel %vm252_vm5, %v1542_v11, %v1532_v0 }
  0xa5   :  { %v410_v18 = vpack.c.bf16 %v286_v13, %v253_v17  ;;  %v1546_v19 = vpop.permute.xlu0 %1545  ;;  %v1551_v23 = vpop.permute.xlu1 %1550 }
  0xa6   :  { %v1547_v24 = vunpack.i.l.bf16 %v1546_v19  ;;  %v1552_v28 = vunpack.i.l.bf16 %v1551_v23  ;;  %v1548_v37 = vunpack.i.h.bf16 %v1546_v19  ;;  %v1553_v39 = vunpack.i.h.bf16 %v1551_v23 }
  0xa7   :  { %452 = vmatpush1.bf16.msra.mxu0 %v410_v18 }
  0xa8   :  { %v84_v26 = vsel %vm80_vm0, %v1493_v14, %v1547_v24  ;;  %v117_v30 = vsel %vm113_vm1, %v1498_v10, %v1552_v28  ;;  %v85_v47 = vsel %vm80_vm0, %v1547_v24, %v1548_v37  ;;  %v118_v48 = vsel %vm113_vm1, %v1552_v28, %v1553_v39 }
  0xa9   :  { %v1556_v31 = vpop.permute.xlu0 %1555  ;;  %v2021_v32 = vpop.permute.xlu1 %308  ;;  %v395_v33 = vpack.c.bf16 %v117_v30, %v84_v26  ;;  %v396_v61 = vpack.c.bf16 %v118_v48, %v85_v47  ;;  %v222_v30 = vsel %vm219_vm4, %v1523_v54, %v1528_v40 }
  0xaa   :  { %v1558_v25 = vunpack.i.h.bf16 %v1556_v31  ;;  %v1557_v41 = vunpack.i.l.bf16 %v1556_v31  ;;  %v406_v54 = vpack.c.bf16 %v222_v30, %v1867_v5 }
  0xab   :  { %486 = vmatprep.subr.bf16.mxu1 %v395_v33  ;;  %v1543_v33 = vunpack.i.h.bf16 %v2006_v3 }
  0xac   :  { %v320_v27 = vsel %vm318_vm7, %v1558_v25, %v2021_v32  ;;  %487 = vmatpush1.bf16.msra.mxu1 %v394_v36  ;;  %v319_v20 = vsel %vm318_vm7, %v1557_v41, %v1558_v25 }
  0xad   :  { %v417_v42 = vpack.c.bf16 %v320_v27, %v320_v27  ;;  %v79_v22 = vpop.permute.xlu0 %78  ;;  %v112_v43 = vpop.permute.xlu1 %111  ;;  %v416_v46 = vpack.c.bf16 %v319_v20, %v319_v20 }
  0xae   :  { %v86_v49 = vsel %vm80_vm0, %v1548_v37, %v79_v22  ;;  %v119_v50 = vsel %vm113_vm1, %v1553_v39, %v112_v43 }
  0xaf   :  { %v397_v56 = vpack.c.bf16 %v119_v50, %v86_v49  ;;  %1443 = vmatprep.subr.msk.bf16.mxu0 %vm426_vm8, %v417_v42  ;;  %v428_v57 = vsel %vm426_vm8, %v416_v46, 0 }
  0xb0   :  { %454 = vmatpush1.bf16.msra.mxu0 %v428_v57 }
  0xb1   :  { %v1561_v62 = vpop.permute.xlu0 %1560  ;;  %v1566_v0 = vpop.permute.xlu1 %1565  ;;  %527 = vmatprep.subr.bf16.mxu0 %v397_v56 }
  0xb2   :  { %v1563_v4 = vunpack.i.h.bf16 %v1561_v62  ;;  %v1562_v6 = vunpack.i.l.bf16 %v1561_v62  ;;  %v1568_v2 = vunpack.i.h.bf16 %v1566_v0  ;;  %v1567_v7 = vunpack.i.l.bf16 %v1566_v0 }
  0xb3   :  { %1444 = vmatmul.mubr.msk.bf16.vlgmr.msra.gmra.mrb[0].mxu0 %vm422_vm9, %v2034_v58 }
  0xb4   :  { %528 = vmatpush1.bf16.msra.mxu0 %v396_v61  ;;  %v150_v8 = vsel %vm146_vm2, %v1513_v53, %v1562_v6  ;;  %v183_v10 = vsel %vm179_vm3, %v1518_v55, %v1567_v7  ;;  %v151_v11 = vsel %vm146_vm2, %v1562_v6, %v1563_v4  ;;  %v184_v13 = vsel %vm179_vm3, %v1567_v7, %v1568_v2 }
  0xb5   :  { %v145_v14 = vpop.permute.xlu0 %144  ;;  %v178_v17 = vpop.permute.xlu1 %177  ;;  %v401_v18 = vpack.c.bf16 %v183_v10, %v150_v8  ;;  %559 = vmatprep.mubr.bf16.mxu0 %v1791_v15  ;;  %v402_v23 = vpack.c.bf16 %v184_v13, %v151_v11 }
  0xb6   :  { %v152_v34 = vsel %vm146_vm2, %v1563_v4, %v145_v14  ;;  %v185_v35 = vsel %vm179_vm3, %v1568_v2, %v178_v17 }
  0xb7   :  { %v403_v19 = vpack.c.bf16 %v185_v35, %v152_v34  ;;  %488 = vmatprep.subr.bf16.mxu1 %v401_v18  ;;  %v569_v18 = vlaneseq }
  0xb8   :  { %489 = vmatpush1.bf16.msra.mxu1 %v400_v38 }
  0xb9   :  { %v1571_v24 = vpop.permute.xlu0 %1570  ;;  %v218_v28 = vpop.permute.xlu1 %217  ;;  %529 = vmatprep.subr.bf16.mxu0 %v403_v19  ;;  %v570_v34 = vshrl.u32 %v569_v18, 7 }
  0xba   :  { %v1573_v29 = vunpack.i.h.bf16 %v1571_v24  ;;  %v1572_v26 = vunpack.i.l.bf16 %v1571_v24  ;;  %530 = vmatpush1.bf16.msra.mxu0 %v402_v23 }
  0xbb   :  { %v571_v35 = vsub.s32 0, %v570_v34  ;;  %v575_v38 = vsub.s32 1, %v570_v34  ;;  %v587_v24 = vsub.s32 4, %v570_v34 }
  0xbc   :  { %v224_v21 = vsel %vm219_vm4, %v1572_v26, %v1573_v29  ;;  %v225_v31 = vsel %vm219_vm4, %v1573_v29, %v218_v28  ;;  %v223_v52 = vsel %vm219_vm4, %v1528_v40, %v1572_v26  ;;  %v46_v40 = vld [vmem:[%s2456_s8] sm:$0x3f]  ;;  %v583_v28 = vsub.s32 3, %v570_v34 }
  0xbd   :  { %v408_v36 = vpack.c.bf16 %v224_v21, %v1893_v12  ;;  %v409_v37 = vpack.c.bf16 %v225_v31, %v1912_v16  ;;  %v1576_v39 = vpop.permute.xlu0 %1575  ;;  %v1581_v25 = vpop.permute.xlu1 %1580  ;;  %v407_v41 = vpack.c.bf16 %v223_v52, %v1881_v9  ;;  %v255_v9 = vsel %vm252_vm5, %v1533_v63, %v1543_v33 }
  0xbe   :  { %v1577_v27 = vunpack.i.l.bf16 %v1576_v39  ;;  %v1583_v51 = vunpack.i.h.bf16 %v1581_v25  ;;  %v1582_v20 = vunpack.i.l.bf16 %v1581_v25  ;;  %v1578_v42 = vunpack.i.h.bf16 %v1576_v39 }
  0xbf   :  { %490 = vmatprep.subr.bf16.mxu1 %v407_v41  ;;  %531 = vmatprep.subr.bf16.mxu0 %v409_v37  ;;  %v2093_v19 = vrot.slane %v46_v40, %v571_v35  ;;  %v2095_v23 = vrot.slane %v46_v40, %v575_v38  ;;  %v2101_v21 = vrot.slane %v46_v40, %v587_v24  ;;  %v591_v31 = vsub.s32 5, %v570_v34 }
  0xc0   :  { %491 = vmatpush1.bf16.msra.mxu1 %v406_v54  ;;  %532 = vmatpush1.bf16.msra.mxu0 %v408_v36  ;;  %v256_v3 = vsel %vm252_vm5, %v1543_v33, %v1577_v27  ;;  %v289_v12 = vsel %vm285_vm6, %v1582_v20, %v1583_v51  ;;  %v288_v5 = vsel %vm285_vm6, %v1538_v1, %v1582_v20 }
  0xc1   :  { %v251_v22 = vpop.permute.xlu0 %250  ;;  %v1586_v16 = vpop.permute.xlu1 %1585  ;;  %v413_v43 = vpack.c.bf16 %v289_v12, %v256_v3  ;;  %v412_v48 = vpack.c.bf16 %v288_v5, %v255_v9  ;;  %v257_v49 = vsel %vm252_vm5, %v1577_v27, %v1578_v42  ;;  %v2103_v52 = vrot.slane %v46_v40, %v583_v28 }
  0xc2   :  { %v1588_v46 = vunpack.i.h.bf16 %v1586_v16  ;;  %v1587_v47 = vunpack.i.l.bf16 %v1586_v16  ;;  %v258_v50 = vsel %vm252_vm5, %v1578_v42, %v251_v22  ;;  %v2107_v54 = vrot.slane %v46_v40, %v591_v31 }
  0xc3   :  { %492 = vmatprep.subr.bf16.mxu1 %v413_v43 }
  0xc4   :  { %v290_v53 = vsel %vm285_vm6, %v1583_v51, %v1587_v47  ;;  %493 = vmatpush1.bf16.msra.mxu1 %v412_v48  ;;  %v291_v55 = vsel %vm285_vm6, %v1587_v47, %v1588_v46 }
  0xc5   :  { %v414_v59 = vpack.c.bf16 %v290_v53, %v257_v49  ;;  %v1591_v56 = vpop.permute.xlu0 %1590  ;;  %v1596_v63 = vpop.permute.xlu1 %1595  ;;  %v415_v57 = vpack.c.bf16 %v291_v55, %v258_v50 }
  0xc6   :  { %v1593_v60 = vunpack.i.h.bf16 %v1591_v56  ;;  %v1592_v61 = vunpack.i.l.bf16 %v1591_v56  ;;  %v1598_v1 = vunpack.i.h.bf16 %v1596_v63  ;;  %v1597_v62 = vunpack.i.l.bf16 %v1596_v63 }
  0xc7   :  { %533 = vmatprep.subr.bf16.mxu0 %v415_v57 }
  0xc8   :  { %v322_v0 = vsel %vm318_vm7, %v1592_v61, %v1593_v60  ;;  %v324_v4 = vsel %vm318_vm7, %v1597_v62, %v1598_v1  ;;  %534 = vmatpush1.bf16.msra.mxu0 %v414_v59  ;;  %v321_v6 = vsel %vm318_vm7, %v2021_v32, %v1592_v61  ;;  %v323_v2 = vsel %vm318_vm7, %v1593_v60, %v1597_v62  ;;  %v650_v60 = vld [vmem:[%s2453_s5] sm:$0xff] }
  0xc9   :  { %v419_v7 = vpack.c.bf16 %v322_v0, %v322_v0  ;;  %v421_v44 = vpack.c.bf16 %v324_v4, %v324_v4  ;;  %v418_v45 = vpack.c.bf16 %v321_v6, %v321_v6  ;;  %v420_v8 = vpack.c.bf16 %v323_v2, %v323_v2 }
  0xcb   :  { %1445 = vmatprep.subr.msk.bf16.mxu1 %vm426_vm8, %v419_v7  ;;  %1447 = vmatprep.subr.msk.bf16.mxu0 %vm426_vm8, %v421_v44  ;;  %v434_v10 = vsel %vm426_vm8, %v418_v45, 0  ;;  %v440_v11 = vsel %vm426_vm8, %v420_v8, 0  ;;  %v637_v7 = vld [vmem:[%s2452_s4] sm:$0xff]  ;;  %v1793_v8 = vmov 0.0  }
  0xcc   :  { %495 = vmatpush1.bf16.msra.mxu1 %v434_v10  ;;  %536 = vmatpush1.bf16.msra.mxu0 %v440_v11 }
  0xcf   :  { %1446 = vmatmul.mubr.msk.bf16.vlgmr.msra.gmra.mrb[0].mxu1 %vm422_vm9, %v2034_v58  ;;  %1448 = vmatmul.mubr.msk.bf16.vlgmr.msra.gmra.mrb[4].mxu0 %vm422_vm9, %v2034_v58  ;;  %v579_v58 = vsub.s32 2, %v570_v34 }
  0xd0   :  { %1104 = vmatprep.mubr.bf16.mxu1 %v1791_v15  ;;  %1145 = vmatprep.mubr.bf16.mxu0 %v1791_v15 }
  0xd1   :  { %v2099_v30 = vrot.slane %v46_v40, %v579_v58 }
 0x186   :  { %v479_v32 = vpop.f32.mrb[0].mxu0 }
 0x187   :  { %v481_v13 = vpop.f32.mrb[1].mxu0  ;;  %v599_v29 = vmul.f32 %v2093_v19, %v479_v32 }
 0x188   :  { %v483_v14 = vpop.f32.mrb[2].mxu0  ;;  %v600_v26 = vmul.f32 %v2095_v23, %v481_v13 }
 0x189   :  { %v484_v17 = vpop.f32.mrb[3].mxu0  ;;  %v613_v33 = vmul.f32 %v599_v29, %v599_v29 }
 0x18a   :  { %v614_v36 = vmul.f32 %v600_v26, %v600_v26  ;;  %v605_v25 = vadd.f32 %v600_v26, %v599_v29 }
 0x18c   :  { %v619_v22 = vadd.f32 %v614_v36, %v613_v33 }
 0x1a2   :  { %v520_v37 = vpop.f32.mrb[0].mxu1  ;;  %v561_v39 = vpop.f32.mrb[4].mxu0 }
 0x1a3   :  { %v601_v41 = vmul.f32 %v2099_v30, %v520_v37  ;;  %v522_v27 = vpop.f32.mrb[1].mxu1  ;;  %v603_v51 = vmul.f32 %v2101_v21, %v561_v39  ;;  %v563_v20 = vpop.f32.mrb[5].mxu0 }
 0x1a4   :  { %v602_v42 = vmul.f32 %v2103_v52, %v522_v27  ;;  %v524_v3 = vpop.f32.mrb[2].mxu1  ;;  %v565_v12 = vpop.f32.mrb[6].mxu0  ;;  %v2111_v50 = vmul.f32 %v2107_v54, %v563_v20 }
 0x1a5   :  { %v606_v16 = vadd.f32 %v605_v25, %v601_v41  ;;  %v615_v43 = vmul.f32 %v601_v41, %v601_v41  ;;  %v525_v9 = vpop.f32.mrb[3].mxu1  ;;  %v566_v5 = vpop.f32.mrb[7].mxu0  ;;  %v617_v49 = vmul.f32 %v603_v51, %v603_v51 }
 0x1a6   :  { %v616_v46 = vmul.f32 %v602_v42, %v602_v42  ;;  %v618_v56 = vmul.f32 %v2111_v50, %v2111_v50 }
 0x1a7   :  { %v620_v47 = vadd.f32 %v619_v22, %v615_v43  ;;  %v607_v48 = vadd.f32 %v606_v16, %v602_v42 }
 0x1a9   :  { %v608_v53 = vadd.f32 %v607_v48, %v603_v51  ;;  %v621_v55 = vadd.f32 %v620_v47, %v616_v46 }
 0x1ab   :  { %v609_v59 = vadd.f32 %v608_v53, %v2111_v50  ;;  %v622_v63 = vadd.f32 %v621_v55, %v617_v49 }
 0x1ad   :  { %610 = vadd.xlane.f32.xlu0 %v609_v59  ;;  %v623_v57 = vadd.f32 %v622_v63, %v618_v56 }
 0x1af   :  { %624 = vadd.xlane.f32.xlu1 %v623_v57 }
 0x1c0   :  { %653 = vperm.xlu1 %1600, %v650_v60  }
 0x1c4   :  { %850 = vrot.lane.b32.xlu1 %v1793_v8, %s1788_s30 }
 0x23a   :  { %v611_v61 = vpop.xlane.xlu0 %610 }
 0x23b   :  { %v612_v1 = vmul.f32 0.001953125, %v611_v61 }
 0x23c   :  { %v625_v62 = vpop.xlane.xlu1 %624 }
 0x23d   :  { %v626_v0 = vmul.f32 0.001953125, %v625_v62  ;;  %v627_v4 = vmul.f32 %v612_v1, %v612_v1  ;;  %v631_v10 = vsub.f32 %v599_v29, %v612_v1  ;;  %v632_v11 = vsub.f32 %v600_v26, %v612_v1 }
 0x23e   :  { %v633_v32 = vsub.f32 %v601_v41, %v612_v1  ;;  %v634_v35 = vsub.f32 %v602_v42, %v612_v1  ;;  %v635_v36 = vsub.f32 %v603_v51, %v612_v1  ;;  %v636_v22 = vsub.f32 %v2111_v50, %v612_v1 }
 0x23f   :  { %v628_v6 = vsub.f32 %v626_v0, %v627_v4 }
 0x240   :  { %v654_v14 = vpop.permute.xlu1 %653 }
 0x241   :  { %v629_v2 = vadd.f32 1e-05, %v628_v6 }
 0x243   :  { %1727 = vrsqrt.f32 %v629_v2 }
 0x244   :  { %v2195_v53 = vpop.permute.xlu1 %850 }
 0x24d   :  { %v1728_v44 = vpop.eup %1727 }
 0x24e   :  { %v638_v45 = vmul.f32 %v1728_v44, %v637_v7 }
 0x250   :  { %641 = vperm.xlu0 %1599, %v638_v45  }
 0x254   :  { %882 = vrot.lane.b32.xlu0 %v1793_v8, %s1789_s10 }
 0x2cf   :  { %v642_v13 = vpop.permute.xlu0 %641 }
 0x2d0   :  { %v644_v17 = vmul.f32 %v642_v13, %v631_v10  ;;  %v645_v18 = vmul.f32 %v642_v13, %v632_v11  ;;  %v646_v34 = vmul.f32 %v642_v13, %v633_v32  ;;  %v647_v24 = vmul.f32 %v642_v13, %v634_v35 }
 0x2d1   :  { %v648_v39 = vmul.f32 %v642_v13, %v635_v36  ;;  %v649_v16 = vmul.f32 %v642_v13, %v636_v22 }
 0x2d2   :  { %v656_v38 = vadd.f32 %v654_v14, %v644_v17  ;;  %v657_v40 = vadd.f32 %v654_v14, %v645_v18  ;;  %v658_v58 = vadd.f32 %v654_v14, %v646_v34  ;;  %v659_v25 = vadd.f32 %v654_v14, %v647_v24 }
 0x2d3   :  { %v660_v51 = vadd.f32 %v654_v14, %v648_v39  ;;  %v661_v5 = vadd.f32 %v654_v14, %v649_v16  ;;  %v2197_v55 = vpop.permute.xlu0 %882 }
 0x2d4   :  { %v662_v28 = vmax.f32 %v656_v38, 0.0  ;;  %v663_v31 = vmax.f32 %v657_v40, 0.0  ;;  %v664_v33 = vmax.f32 %v658_v58, 0.0  ;;  %v665_v20 = vmax.f32 %v659_v25, 0.0 }
 0x2d5   :  { %v666_v3 = vmax.f32 %v660_v51, 0.0  ;;  %v667_v47 = vmax.f32 %v661_v5, 0.0 }
 0x2d6   :  { %v2127_v37 = vmul.f32 %v662_v28, %v2093_v19  ;;  %v2130_v29 = vmul.f32 %v663_v31, %v2095_v23  ;;  %v2133_v26 = vmul.f32 %v664_v33, %v2099_v30  ;;  %v2146_v12 = vmul.f32 %v665_v20, %v2103_v52 }
 0x2d7   :  { %v2152_v43 = vmul.f32 %v666_v3, %v2101_v21  ;;  %v2165_v48 = vmul.f32 %v667_v47, %v2107_v54 }
 0x2d8   :  { %v1631_v41 = vpack.i.bf16 %v2133_v26, %v1793_v8  ;;  %v1601_v27 = vpack.i.bf16 %v2130_v29, %v2127_v37  ;;  %v1641_v42 = vpack.i.bf16 %v2133_v26, %v2130_v29  ;;  %v1661_v9 = vpack.i.bf16 %v2146_v12, %v2127_v37 }
 0x2d9   :  { %v1666_v46 = vpack.i.bf16 %v2152_v43, %v2146_v12  ;;  %v1691_v49 = vpack.i.bf16 %v2165_v48, %v2152_v43  ;;  %v1706_v50 = vpack.i.bf16 %v1793_v8, %v2165_v48 }
 0x2da   :  { %1632 = vrot.lane.b32.xlu0 %v1631_v41, %s1786_s28  ;;  %1602 = vrot.lane.b32.xlu1 %v1601_v27, %s1784_s1 }
 0x2de   :  { %1642 = vrot.lane.b32.xlu0 %v1641_v42, %s1788_s30  ;;  %1607 = vrot.lane.b32.xlu1 %v1601_v27, %s1785_s25 }
 0x2e2   :  { %1652 = vrot.lane.b32.xlu0 %v1641_v42, %s1789_s10  ;;  %1612 = vrot.lane.b32.xlu1 %v1631_v41, %s1784_s1 }
 0x2e6   :  { %1662 = vrot.lane.b32.xlu0 %v1661_v9, %s1789_s10  ;;  %1617 = vrot.lane.b32.xlu1 %v1631_v41, %s1785_s25 }
 0x2ea   :  { %1667 = vrot.lane.b32.xlu0 %v1666_v46, %s1784_s1  ;;  %1622 = vrot.lane.b32.xlu1 %v1601_v27, %s1786_s28 }
 0x2ee   :  { %1677 = vrot.lane.b32.xlu0 %v1601_v27, %s1792_s14  ;;  %1627 = vrot.lane.b32.xlu1 %v1601_v27, %s1787_s29 }
 0x2f2   :  { %715 = vrot.lane.b32.xlu0 %v2165_v48, %s1784_s1  ;;  %1637 = vrot.lane.b32.xlu1 %v1631_v41, %s1787_s29 }
 0x2f6   :  { %1682 = vrot.lane.b32.xlu0 %v1666_v46, %s1786_s28  ;;  %1647 = vrot.lane.b32.xlu1 %v1661_v9, %s1788_s30 }
 0x2fa   :  { %779 = vrot.lane.b32.xlu0 %v2165_v48, %s1786_s28  ;;  %1657 = vrot.lane.b32.xlu1 %v1641_v42, %s1790_s11 }
 0x2fe   :  { %1692 = vrot.lane.b32.xlu0 %v1691_v49, %s1788_s30  ;;  %902 = vrot.lane.b32.xlu1 %v2127_v37, %s1790_s11 }
 0x302   :  { %1697 = vrot.lane.b32.xlu0 %v1691_v49, %s1789_s10  ;;  %1672 = vrot.lane.b32.xlu1 %v1666_v46, %s1785_s25 }
 0x306   :  { %1712 = vrot.lane.b32.xlu0 %v1666_v46, %s1792_s14  ;;  %938 = vrot.lane.b32.xlu1 %v2133_v26, %s1792_s14 }
 0x30a   :  { %747 = vrot.lane.b32.xlu1 %v2165_v48, %s1785_s25 }
 0x30e   :  { %1687 = vrot.lane.b32.xlu1 %v1666_v46, %s1787_s29 }
 0x312   :  { %811 = vrot.lane.b32.xlu1 %v2165_v48, %s1787_s29 }
 0x316   :  { %1702 = vrot.lane.b32.xlu1 %v1666_v46, %s1790_s11 }
 0x31a   :  { %1707 = vrot.lane.b32.xlu1 %v1706_v50, %s1790_s11 }
 0x31e   :  { %1717 = vrot.lane.b32.xlu1 %v1706_v50, %s1792_s14 }
 0x34c   :  { %v2199_v59 = vpop.permute.xlu1 %1602  ;;  %v2201_v56 = vpop.permute.xlu0 %1632 }
 0x34d   :  { %v1605_v63 = vunpack.i.h.bf16 %v2199_v59  ;;  %v1604_v57 = vunpack.i.l.bf16 %v2199_v59  ;;  %v1634_v25 = vunpack.i.l.bf16 %v2201_v56 }
 0x34f   :  { %v718_v0 = vsel %vm80_vm0, %v1604_v57, %v1605_v63 }
 0x350   :  { %v2205_v60 = vpop.permute.xlu1 %1607  ;;  %v2207_v61 = vpop.permute.xlu0 %1642 }
 0x351   :  { %v1610_v1 = vunpack.i.h.bf16 %v2205_v60  ;;  %v1609_v62 = vunpack.i.l.bf16 %v2205_v60  ;;  %v1645_v24 = vunpack.i.h.bf16 %v2207_v61  ;;  %v1644_v28 = vunpack.i.l.bf16 %v2207_v61 }
 0x353   :  { %v750_v4 = vsel %vm113_vm1, %v1609_v62, %v1610_v1  ;;  %v853_v51 = vsel %vm219_vm4, %v1644_v28, %v1645_v24 }
 0x354   :  { %v2217_v6 = vpop.permute.xlu1 %1612  ;;  %v2219_v2 = vpop.permute.xlu0 %1652  ;;  %v1022_v7 = vpack.c.bf16 %v750_v4, %v718_v0  ;;  %v1034_v9 = vpack.c.bf16 %v853_v51, %v2130_v29 }
 0x355   :  { %v1614_v44 = vunpack.i.l.bf16 %v2217_v6  ;;  %v1655_v5 = vunpack.i.h.bf16 %v2219_v2  ;;  %v1654_v46 = vunpack.i.l.bf16 %v2219_v2 }
 0x356   :  { %1072 = vmatprep.subr.bf16.mxu1 %v1022_v7 }
 0x357   :  { %v717_v11 = vsel %vm80_vm0, %v1614_v44, %v1604_v57  ;;  %v885_v4 = vsel %vm252_vm5, %v1654_v46, %v1655_v5 }
 0x358   :  { %v2222_v45 = vpop.permute.xlu1 %1617  ;;  %v2224_v8 = vpop.permute.xlu0 %1662 }
 0x359   :  { %v1619_v10 = vunpack.i.l.bf16 %v2222_v45 }
 0x35b   :  { %v749_v32 = vsel %vm113_vm1, %v1619_v10, %v1609_v62  ;;  %v1664_v62 = vunpack.i.l.bf16 %v2224_v8 }
 0x35c   :  { %v1021_v13 = vpack.c.bf16 %v749_v32, %v717_v11  ;;  %v2229_v14 = vpop.permute.xlu1 %1622  ;;  %v2231_v17 = vpop.permute.xlu0 %1667 }
 0x35d   :  { %v1625_v18 = vunpack.i.h.bf16 %v2229_v14  ;;  %v1624_v34 = vunpack.i.l.bf16 %v2229_v14  ;;  %v884_v32 = vsel %vm252_vm5, %v1664_v62, %v1654_v46 }
 0x35e   :  { %1073 = vmatpush1.bf16.msra.mxu1 %v1021_v13 }
 0x35f   :  { %v782_v31 = vsel %vm146_vm2, %v1624_v34, %v1625_v18  ;;  %v781_v20 = vsel %vm146_vm2, %v1634_v25, %v1624_v34  ;;  %v1620_v34 = vunpack.i.h.bf16 %v2222_v45 }
 0x360   :  { %v2235_v35 = vpop.permute.xlu1 %1627  ;;  %v1678_v38 = vpop.permute.xlu0 %1677 }
 0x361   :  { %v1630_v40 = vunpack.i.h.bf16 %v2235_v35  ;;  %v1629_v58 = vunpack.i.l.bf16 %v2235_v35  ;;  %v1680_v10 = vunpack.i.h.bf16 %v1678_v38  ;;  %v1679_v11 = vunpack.i.l.bf16 %v1678_v38 }
 0x362   :  { %v751_v38 = vsel %vm113_vm1, %v1610_v1, %v1620_v34  ;;  %v1670_v1 = vunpack.i.h.bf16 %v2231_v17 }
 0x363   :  { %v814_v33 = vsel %vm179_vm3, %v1629_v58, %v1630_v40 }
 0x364   :  { %v2247_v36 = vpop.permute.xlu1 %1637  ;;  %v1028_v39 = vpack.c.bf16 %v814_v33, %v782_v31  ;;  %v716_v27 = vpop.permute.xlu0 %715  ;;  %v1669_v31 = vunpack.i.l.bf16 %v2231_v17  ;;  %v1615_v33 = vunpack.i.h.bf16 %v2217_v6  ;;  %v2307_v17 = vld [vmem:[%s2450_s2] sm:$0xf] }
 0x365   :  { %v1639_v41 = vunpack.i.l.bf16 %v2247_v36 }
 0x366   :  { %1074 = vmatprep.subr.bf16.mxu1 %v1028_v39  ;;  %v720_v51 = vsel %vm80_vm0, %v1615_v33, %v1669_v31 }
 0x367   :  { %v813_v42 = vsel %vm179_vm3, %v1639_v41, %v1629_v58  ;;  %v948_v41 = vsel %vm318_vm7, %v1679_v11, %v1680_v10 }
 0x368   :  { %v1027_v3 = vpack.c.bf16 %v813_v42, %v781_v20  ;;  %v2256_v22 = vpop.permute.xlu1 %1647  ;;  %v2264_v50 = vpop.permute.xlu0 %1682  ;;  %v719_v20 = vsel %vm80_vm0, %v1605_v63, %v1615_v33 }
 0x369   :  { %v1649_v16 = vunpack.i.l.bf16 %v2256_v22  ;;  %v1023_v46 = vpack.c.bf16 %v751_v38, %v719_v20 }
 0x36a   :  { %1075 = vmatpush1.bf16.msra.mxu1 %v1027_v3 }
 0x36b   :  { %v852_v47 = vsel %vm219_vm4, %v1649_v16, %v1644_v28  ;;  %1076 = vmatprep.subr.bf16.mxu1 %v1034_v9  ;;  %v1045_v9 = vpack.c.bf16 %v948_v41, %v948_v41 }
 0x36c   :  { %v1033_v49 = vpack.c.bf16 %v852_v47, %v2127_v37  ;;  %v2266_v57 = vpop.permute.xlu1 %1657  ;;  %v2280_v58 = vpop.permute.xlu0 %779 }
 0x36d   :  { %v1660_v0 = vunpack.i.h.bf16 %v2266_v57  ;;  %v1659_v29 = vunpack.i.l.bf16 %v2266_v57  ;;  %v1055_v62 = vsel %vm426_vm8, %v1045_v9, 0 }
 0x36e   :  { %1077 = vmatpush1.bf16.msra.mxu1 %v1033_v49  ;;  %v1640_v49 = vunpack.i.h.bf16 %v2247_v36 }
 0x36f   :  { %v917_v7 = vsel %vm285_vm6, %v1659_v29, %v1660_v0 }
 0x370   :  { %v903_v37 = vpop.permute.xlu1 %902  ;;  %v1040_v44 = vpack.c.bf16 %v917_v7, %v885_v4  ;;  %v1693_v42 = vpop.permute.xlu0 %1692  ;;  %v721_v7 = vsel %vm80_vm0, %v1669_v31, %v1670_v1 }
 0x371   :  { %v916_v13 = vsel %vm285_vm6, %v903_v37, %v1659_v29  ;;  %v722_v29 = vsel %vm80_vm0, %v1670_v1, %v716_v27  ;;  %v815_v27 = vsel %vm179_vm3, %v1630_v40, %v1640_v49 }
 0x372   :  { %v1039_v28 = vpack.c.bf16 %v916_v13, %v884_v32  ;;  %1078 = vmatprep.subr.bf16.mxu1 %v1040_v44  ;;  %v1684_v44 = vunpack.i.l.bf16 %v2264_v50  ;;  %v1635_v32 = vunpack.i.h.bf16 %v2201_v56 }
 0x374   :  { %v1673_v39 = vpop.permute.xlu1 %1672  ;;  %1079 = vmatpush1.bf16.msra.mxu1 %v1039_v28  ;;  %v2310_v36 = vpop.permute.xlu0 %1697  ;;  %v1695_v28 = vunpack.i.h.bf16 %v1693_v42  ;;  %v783_v56 = vsel %vm146_vm2, %v1625_v18, %v1635_v32  ;;  %v784_v35 = vsel %vm146_vm2, %v1635_v32, %v1684_v44 }
 0x375   :  { %v1674_v25 = vunpack.i.l.bf16 %v1673_v39  ;;  %v1675_v3 = vunpack.i.h.bf16 %v1673_v39  ;;  %v1685_v39 = vunpack.i.h.bf16 %v2264_v50  ;;  %v1029_v41 = vpack.c.bf16 %v815_v27, %v783_v56 }
 0x377   :  { %v752_v45 = vsel %vm113_vm1, %v1620_v34, %v1674_v25  ;;  %v753_v59 = vsel %vm113_vm1, %v1674_v25, %v1675_v3  ;;  %v1650_v34 = vunpack.i.h.bf16 %v2256_v22  ;;  %v1665_v22 = vunpack.i.h.bf16 %v2224_v8 }
 0x378   :  { %v2293_v6 = vpop.permute.xlu1 %938  ;;  %v1024_v16 = vpack.c.bf16 %v752_v45, %v720_v51  ;;  %v1025_v11 = vpack.c.bf16 %v753_v59, %v721_v7  ;;  %v2329_v38 = vpop.permute.xlu0 %1712  ;;  %v786_v18 = vsel %vm146_vm2, %v1685_v39, %v2280_v58  ;;  %v785_v8 = vsel %vm146_vm2, %v1684_v44, %v1685_v39 }
 0x379   :  { %v949_v60 = vsel %vm318_vm7, %v1680_v10, %v2293_v6  ;;  %v1694_v10 = vunpack.i.l.bf16 %v1693_v42  ;;  %v854_v14 = vsel %vm219_vm4, %v1645_v24, %v1650_v34  ;;  %v857_v42 = vsel %vm219_vm4, %v1695_v28, %v2195_v53 }
 0x37a   :  { %v1046_v47 = vpack.c.bf16 %v949_v60, %v949_v60  ;;  %1113 = vmatprep.subr.bf16.mxu0 %v1024_v16  ;;  %v1715_v24 = vunpack.i.h.bf16 %v2329_v38  ;;  %v1038_v53 = vpack.c.bf16 %v857_v42, %v2165_v48  ;;  %v1035_v1 = vpack.c.bf16 %v854_v14, %v2133_v26 }
 0x37b   :  { %1114 = vmatpush1.bf16.msra.mxu0 %v1023_v46  ;;  %v855_v25 = vsel %vm219_vm4, %v1650_v34, %v1694_v10  ;;  %v856_v61 = vsel %vm219_vm4, %v1694_v10, %v1695_v28  ;;  %v1714_v46 = vunpack.i.l.bf16 %v2329_v38 }
 0x37c   :  { %v748_v63 = vpop.permute.xlu1 %747  ;;  %1449 = vmatprep.subr.msk.bf16.mxu1 %vm426_vm8, %v1046_v47  ;;  %v1036_v9 = vpack.c.bf16 %v855_v25, %v2146_v12  ;;  %v886_v12 = vsel %vm252_vm5, %v1655_v5, %v1665_v22  ;;  %v1037_v59 = vpack.c.bf16 %v856_v61, %v2152_v43  ;;  %v1732_v25 = vld [vmem:[%s2448_s0] sm:$0xff] }
 0x37d   :  { %v754_v4 = vsel %vm113_vm1, %v1675_v3, %v748_v63  ;;  %1081 = vmatpush1.bf16.msra.mxu1 %v1055_v62  ;;  %v1699_v3 = vunpack.i.l.bf16 %v2310_v36  ;;  %v1700_v63 = vunpack.i.h.bf16 %v2310_v36  ;;  %v950_v2 = vsel %vm318_vm7, %v2293_v6, %v1714_v46 }
 0x37e   :  { %v1026_v37 = vpack.c.bf16 %v754_v4, %v722_v29  ;;  %v951_v29 = vsel %vm318_vm7, %v1714_v46, %v1715_v24  ;;  %v1047_v44 = vpack.c.bf16 %v950_v2, %v950_v2 }
 0x37f   :  { %v887_v62 = vsel %vm252_vm5, %v1665_v22, %v1699_v3  ;;  %v888_v10 = vsel %vm252_vm5, %v1699_v3, %v1700_v63  ;;  %v1455_v22 = vcombine.high %v1732_v25, %v1732_v25 }
 0x380   :  { %v1688_v13 = vpop.permute.xlu1 %1687  ;;  %1154 = vmatprep.subr.bf16.mxu1 %v1026_v37  ;;  %1450 = vmatmul.mubr.msk.bf16.vlgmr.msra.gmra.mrb[4].mxu1 %vm422_vm9, %v2307_v17  ;;  %v1048_v37 = vpack.c.bf16 %v951_v29, %v951_v29  ;;  %v1061_v28 = vsel %vm426_vm8, %v1047_v44, 0 }
 0x381   :  { %v1690_v31 = vunpack.i.h.bf16 %v1688_v13  ;;  %v1689_v33 = vunpack.i.l.bf16 %v1688_v13  ;;  %1155 = vmatpush1.bf16.msra.mxu1 %v1025_v11  ;;  %1186 = vmatprep.mubr.bf16.mxu1 %v1791_v15  ;;  %v1270_v14 = vsel %vm426_vm8, %v1455_v22, 0 }
 0x383   :  { %v816_v40 = vsel %vm179_vm3, %v1640_v49, %v1689_v33  ;;  %v817_v51 = vsel %vm179_vm3, %v1689_v33, %v1690_v31 }
 0x384   :  { %v812_v45 = vpop.permute.xlu1 %811  ;;  %v1030_v20 = vpack.c.bf16 %v816_v40, %v784_v35  ;;  %v1031_v58 = vpack.c.bf16 %v817_v51, %v785_v8  ;;  %v1731_v35 = vld [vmem:[%s2448_s0 + $0x8] sm:$0xff] }
 0x385   :  { %v818_v50 = vsel %vm179_vm3, %v1690_v31, %v812_v45  ;;  %v1456_v40 = vcombine.low %v1731_v35, %v1731_v35  ;;  %v1457_v45 = vcombine.high %v1731_v35, %v1731_v35 }
 0x386   :  { %v1032_v16 = vpack.c.bf16 %v818_v50, %v786_v18  ;;  %1115 = vmatprep.subr.bf16.mxu0 %v1030_v20  ;;  %v1258_v18 = vld [vmem:[%s2451_s3] sm:$0xf] }
 0x387   :  { %1116 = vmatpush1.bf16.msra.mxu0 %v1029_v41  ;;  %v1733_v41 = vld [vmem:[%s2448_s0 + $0x10] sm:$0xff]  ;;  %v1276_v50 = vsel %vm426_vm8, %v1457_v45, 0 }
 0x388   :  { %v1703_v60 = vpop.permute.xlu1 %1702  ;;  %1117 = vmatprep.subr.bf16.mxu0 %v1036_v9  ;;  %1156 = vmatprep.subr.bf16.mxu1 %v1032_v16  ;;  %v1458_v38 = vcombine.low %v1733_v41, %v1733_v41  ;;  %v1459_v20 = vcombine.high %v1733_v41, %v1733_v41 }
 0x389   :  { %v1705_v47 = vunpack.i.h.bf16 %v1703_v60  ;;  %v1704_v49 = vunpack.i.l.bf16 %v1703_v60  ;;  %1157 = vmatpush1.bf16.msra.mxu1 %v1031_v58 }
 0x38a   :  { %1158 = vmatprep.subr.bf16.mxu1 %v1038_v53  ;;  %v1282_v42 = vsel %vm426_vm8, %v1459_v20, 0 }
 0x38b   :  { %v918_v26 = vsel %vm285_vm6, %v1660_v0, %v1704_v49  ;;  %1118 = vmatpush1.bf16.msra.mxu0 %v1035_v1  ;;  %v919_v48 = vsel %vm285_vm6, %v1704_v49, %v1705_v47  ;;  %v889_v0 = vsel %vm252_vm5, %v1700_v63, %v2197_v55 }
 0x38c   :  { %v1041_v5 = vpack.c.bf16 %v918_v26, %v886_v12  ;;  %v1708_v4 = vpop.permute.xlu1 %1707  ;;  %v1042_v43 = vpack.c.bf16 %v919_v48, %v887_v62 }
 0x38d   :  { %v1710_v7 = vunpack.i.h.bf16 %v1708_v4  ;;  %v1709_v36 = vunpack.i.l.bf16 %v1708_v4  ;;  %1159 = vmatpush1.bf16.msra.mxu1 %v1037_v59 }
 0x38e   :  { %1119 = vmatprep.subr.bf16.mxu0 %v1042_v43 }
 0x38f   :  { %v920_v57 = vsel %vm285_vm6, %v1705_v47, %v1709_v36  ;;  %1120 = vmatpush1.bf16.msra.mxu0 %v1041_v5  ;;  %v921_v11 = vsel %vm285_vm6, %v1709_v36, %v1710_v7 }
 0x390   :  { %v1043_v6 = vpack.c.bf16 %v920_v57, %v888_v10  ;;  %v1718_v32 = vpop.permute.xlu1 %1717  ;;  %1451 = vmatprep.subr.msk.bf16.mxu0 %vm426_vm8, %v1048_v37  ;;  %v1044_v27 = vpack.c.bf16 %v921_v11, %v889_v0  ;;  %v1246_v57 = vld [vmem:[%s2455_s7] sm:$0xff] }
 0x391   :  { %v1720_v13 = vunpack.i.h.bf16 %v1718_v32  ;;  %v1719_v34 = vunpack.i.l.bf16 %v1718_v32 }
 0x392   :  { %1160 = vmatprep.subr.bf16.mxu1 %v1044_v27 }
 0x393   :  { %v953_v31 = vsel %vm318_vm7, %v1719_v34, %v1720_v13  ;;  %1122 = vmatpush1.bf16.msra.mxu0 %v1061_v28  ;;  %1161 = vmatpush1.bf16.msra.mxu1 %v1043_v6  ;;  %v952_v33 = vsel %vm318_vm7, %v1715_v24, %v1719_v34 }
 0x394   :  { %v1050_v39 = vpack.c.bf16 %v953_v31, %v953_v31  ;;  %v1049_v55 = vpack.c.bf16 %v952_v33, %v952_v33  ;;  %1461 = vmatprep.subr.msk.bf16.mxu0 %vm426_vm8, %v1456_v40 }
 0x396   :  { %1452 = vmatmul.mubr.msk.bf16.vlgmr.msra.gmra.mrb[8].mxu0 %vm422_vm9, %v2307_v17  ;;  %1453 = vmatprep.subr.msk.bf16.mxu1 %vm426_vm8, %v1050_v39  ;;  %v1067_v56 = vsel %vm426_vm8, %v1049_v55, 0  ;;  %v1233_v39 = vld [vmem:[%s2454_s6] sm:$0xff]  ;;  %s1794_s6 = smov [#allocation7]  }
 0x397   :  { %1163 = vmatpush1.bf16.msra.mxu1 %v1067_v56  ;;  %1319 = vmatprep.mubr.bf16.mxu0 %v1791_v15  ;;  %s1434_s7 = sshll.u32 %s1794_s6, 4  ;;  %s1435_s7 = int_to_ptr.vmem [resolvable:$true] %s1434_s7 }
 0x398   :  { %1463 = vmatprep.subr.msk.bf16.mxu1 %vm426_vm8, %v1458_v38  ;;  %1288 = vmatpush1.bf16.msra.mxu0 %v1270_v14  ;;  %s1757_s30 = scalar_lea.vmem %s1435_s7, 768  ;;  %p1762_p9 = scmp.lt.s32.totalorder %s1435_s7, %s1435_s7 }
 0x399   :  { %p1758_p8 = scmp.ne.s32.totalorder %s1435_s7, %s1757_s30  ;;  %p1763_p10 = scmp.lt.s32.totalorder %s1757_s30, %s1757_s30 }
 0x39a   :  { %1454 = vmatmul.mubr.msk.bf16.vlgmr.msra.gmra.mrb[8].mxu1 %vm422_vm9, %v2307_v17  ;;  %v1734_v17 = vld [vmem:[%s2448_s0 + $0x18] sm:$0xff] }
 0x39b   :  { %1360 = vmatprep.mubr.bf16.mxu1 %v1791_v15  ;;  %v1460_v51 = vcombine.low %v1734_v17, %v1734_v17  ;;  %1329 = vmatpush1.bf16.msra.mxu1 %v1276_v50  ;;  %p1764_p11 = por %p1763_p10, %p1762_p9 }
 0x39d   :  { %1465 = vmatprep.subr.msk.bf16.mxu0 %vm426_vm8, %v1460_v51  ;;  %p1765_p12 = pnand %p1764_p11, %p1758_p8 }
 0x39e   :  { %1462 = vmatmul.mubr.msk.bf16.vlgmr.msra.gmra.mrb[12].mxu0 %vm1265_vm10, %v1258_v18 }
 0x39f   :  { %1370 = vmatpush1.bf16.msra.mxu0 %v1282_v42  ;;  %1401 = vmatprep.mubr.bf16.mxu0 %v1791_v15 }
 0x3a2   :  { %1464 = vmatmul.mubr.msk.bf16.vlgmr.msra.gmra.mrb[12].mxu1 %vm1265_vm10, %v1258_v18 }
 0x3a6   :  { %1466 = vmatmul.mubr.msk.bf16.vlgmr.msra.gmra.mrb[16].mxu0 %vm1265_vm10, %v1258_v18 }
 0x453   :  { %v1106_v8 = vpop.f32.mrb[4].mxu1 }
 0x454   :  { %v1108_v3 = vpop.f32.mrb[5].mxu1  ;;  %v2401_v61 = vmul.f32 %v1106_v8, %v2093_v19 }
 0x455   :  { %v1110_v16 = vpop.f32.mrb[6].mxu1  ;;  %v2404_v24 = vmul.f32 %v1108_v3, %v2095_v23 }
 0x456   :  { %v1111_v9 = vpop.f32.mrb[7].mxu1  ;;  %v1209_v46 = vmul.f32 %v2401_v61, %v2401_v61 }
 0x457   :  { %v1210_v58 = vmul.f32 %v2404_v24, %v2404_v24  ;;  %v1201_v15 = vadd.f32 %v2404_v24, %v2401_v61 }
 0x459   :  { %v1215_v23 = vadd.f32 %v1210_v58, %v1209_v46 }
 0x469   :  { %v1147_v60 = vpop.f32.mrb[8].mxu0 }
 0x46a   :  { %v2413_v53 = vmul.f32 %v1147_v60, %v2099_v30  ;;  %v1149_v1 = vpop.f32.mrb[9].mxu0 }
 0x46b   :  { %v2416_v19 = vmul.f32 %v1149_v1, %v2103_v52  ;;  %v1151_v47 = vpop.f32.mrb[10].mxu0 }
 0x46c   :  { %v1202_v49 = vadd.f32 %v1201_v15, %v2413_v53  ;;  %v1211_v12 = vmul.f32 %v2413_v53, %v2413_v53  ;;  %v1152_v59 = vpop.f32.mrb[11].mxu0 }
 0x46d   :  { %v1212_v63 = vmul.f32 %v2416_v19, %v2416_v19  ;;  %v1188_v62 = vpop.f32.mrb[8].mxu1 }
 0x46e   :  { %v1216_v29 = vadd.f32 %v1215_v23, %v1211_v12  ;;  %v1203_v30 = vadd.f32 %v1202_v49, %v2416_v19  ;;  %v1199_v26 = vmul.f32 %v1188_v62, %v2101_v21  ;;  %v1190_v48 = vpop.f32.mrb[9].mxu1 }
 0x46f   :  { %v1200_v52 = vmul.f32 %v1190_v48, %v2107_v54  ;;  %v1192_v2 = vpop.f32.mrb[10].mxu1 }
 0x470   :  { %v1213_v5 = vmul.f32 %v1199_v26, %v1199_v26  ;;  %v1193_v4 = vpop.f32.mrb[11].mxu1  ;;  %v1204_v43 = vadd.f32 %v1203_v30, %v1199_v26  ;;  %v1217_v7 = vadd.f32 %v1216_v29, %v1212_v63 }
 0x471   :  { %v1214_v36 = vmul.f32 %v1200_v52, %v1200_v52  ;;  %v1321_v21 = vpop.f32.mrb[12].mxu0 }
 0x472   :  { %v1205_v37 = vadd.f32 %v1204_v43, %v1200_v52  ;;  %v1218_v44 = vadd.f32 %v1217_v7, %v1213_v5  ;;  %v1323_v0 = vpop.f32.mrb[13].mxu0 }
 0x473   :  { %v1325_v11 = vpop.f32.mrb[14].mxu0 }
 0x474   :  { %1206 = vadd.xlane.f32.xlu0 %v1205_v37  ;;  %v1219_v10 = vadd.f32 %v1218_v44, %v1214_v36  ;;  %v1326_v54 = vpop.f32.mrb[15].mxu0 }
 0x475   :  { %v1362_v35 = vpop.f32.mrb[12].mxu1 }
 0x476   :  { %1220 = vadd.xlane.f32.xlu1 %v1219_v10  ;;  %v1364_v40 = vpop.f32.mrb[13].mxu1 }
 0x477   :  { %v1366_v22 = vpop.f32.mrb[14].mxu1 }
 0x478   :  { %v1367_v38 = vpop.f32.mrb[15].mxu1 }
 0x479   :  { %v1403_v6 = vpop.f32.mrb[16].mxu0 }
 0x47a   :  { %v1405_v25 = vpop.f32.mrb[17].mxu0 }
 0x47b   :  { %v1407_v41 = vpop.f32.mrb[18].mxu0 }
 0x47c   :  { %v1408_v17 = vpop.f32.mrb[19].mxu0 }
 0x487   :  { %1249 = vperm.xlu1 %1600, %v1246_v57  }
 0x501   :  { %v1207_v32 = vpop.xlane.xlu0 %1206 }
 0x502   :  { %v1208_v27 = vmul.f32 0.001953125, %v1207_v32 }
 0x503   :  { %v1221_v13 = vpop.xlane.xlu1 %1220 }
 0x504   :  { %v1222_v34 = vmul.f32 0.001953125, %v1221_v13  ;;  %v1223_v28 = vmul.f32 %v1208_v27, %v1208_v27  ;;  %v1227_v51 = vsub.f32 %v2401_v61, %v1208_v27  ;;  %v1228_v45 = vsub.f32 %v2404_v24, %v1208_v27 }
 0x505   :  { %v1231_v20 = vsub.f32 %v1199_v26, %v1208_v27  ;;  %v1229_v14 = vsub.f32 %v2413_v53, %v1208_v27  ;;  %v1230_v50 = vsub.f32 %v2416_v19, %v1208_v27  ;;  %v1232_v42 = vsub.f32 %v1200_v52, %v1208_v27 }
 0x506   :  { %v1224_v31 = vsub.f32 %v1222_v34, %v1223_v28 }
 0x507   :  { %v1250_v46 = vpop.permute.xlu1 %1249 }
 0x508   :  { %v1225_v33 = vadd.f32 1e-05, %v1224_v31 }
 0x50a   :  { %1729 = vrsqrt.f32 %v1225_v33 }
 0x514   :  { %v1730_v55 = vpop.eup %1729 }
 0x515   :  { %v1234_v56 = vmul.f32 %v1730_v55, %v1233_v39 }
 0x517   :  { %1237 = vperm.xlu0 %1599, %v1234_v56  }
 0x596   :  { %v1238_v18 = vpop.permute.xlu0 %1237 }
 0x597   :  { %v1240_v8 = vmul.f32 %v1238_v18, %v1227_v51  ;;  %v1241_v3 = vmul.f32 %v1238_v18, %v1228_v45  ;;  %v1244_v16 = vmul.f32 %v1238_v18, %v1231_v20  ;;  %v1242_v9 = vmul.f32 %v1238_v18, %v1229_v14 }
 0x598   :  { %v1243_v58 = vmul.f32 %v1238_v18, %v1230_v50  ;;  %v1245_v60 = vmul.f32 %v1238_v18, %v1232_v42 }
 0x599   :  { %v1252_v15 = vadd.f32 %v1250_v46, %v1240_v8  ;;  %v1253_v1 = vadd.f32 %v1250_v46, %v1241_v3  ;;  %v1256_v47 = vadd.f32 %v1250_v46, %v1244_v16  ;;  %v1254_v61 = vadd.f32 %v1250_v46, %v1242_v9 }
 0x59a   :  { %v1255_v23 = vadd.f32 %v1250_v46, %v1243_v58  ;;  %v1257_v24 = vadd.f32 %v1250_v46, %v1245_v60 }
 0x59b   :  { %v1410_v49 = vadd.f32 %v1321_v21, %v1252_v15  ;;  %v1411_v12 = vadd.f32 %v1323_v0, %v1253_v1  ;;  %v1414_v53 = vadd.f32 %v1403_v6, %v1256_v47  ;;  %v1412_v59 = vadd.f32 %v1362_v35, %v1254_v61 }
 0x59c   :  { %v1413_v19 = vadd.f32 %v1364_v40, %v1255_v23  ;;  %v1415_v63 = vadd.f32 %v1405_v25, %v1257_v24 }
 0x59d   :  { %v1416_v62 = vmax.f32 %v1410_v49, 0.0  ;;  %v1417_v29 = vmax.f32 %v1411_v12, 0.0  ;;  %v1420_v30 = vmax.f32 %v1414_v53, 0.0  ;;  %v1418_v26 = vmax.f32 %v1412_v59, 0.0 }
 0x59e   :  { %v1419_v48 = vmax.f32 %v1413_v19, 0.0  ;;  %v1421_v52 = vmax.f32 %v1415_v63, 0.0 }
 0x59f   :  { %1422 = vst [vmem:[#allocation7] sm:$0xff] %v1416_v62  ;;  %1423 = vst [vmem:[#allocation7 + $0x8] sm:$0xff] %v1417_v29 }
 0x5a0   :  { %1426 = vst [vmem:[#allocation7 + $0x20] sm:$0xff] %v1420_v30  ;;  %1424 = vst [vmem:[#allocation7 + $0x10] sm:$0xff] %v1418_v26 }
 0x5a1   :  { %1425 = vst [vmem:[#allocation7 + $0x18] sm:$0xff] %v1419_v48  ;;  %1427 = vst [vmem:[#allocation7 + $0x28] sm:$0xff] %v1421_v52 }
 0x5a2   :  { %1768 = shalt.err (!%p1765_p12)
}
 0x5a3   :  { %s1769_s12 = scalar_lea.hbm %s2457_s9, 768 }
 0x5a4   :  { %p1770_p13 = scmp.ne.s32.totalorder %s2457_s9, %s1769_s12  ;;  %p1773_p0 = scmp.lt.u32.totalorder %s1769_s12, %s2457_s9 }
 0x5a6   :  { %p1775_p1 = pnand %p1773_p0, %p1770_p13 }
 0x5a8   :  { %1778 = shalt.err (!%p1775_p1)
}
 0x5a9   :  { %1437 = dma.vmem_to_hbm [thread:$0]  %s1435_s7, 768, %s2457_s9, [#allocation6]  }
 0x5aa   :  { %1781 = dma.done.wait [#allocation6], 768  }
 0x5ab   :  { %1782 = vsyncadd [#allocation6], 4294966528 }
 0x5ac   :  { %1441 = vsyncpa [#allocation5], 1 }
 0x5ad   :  { %1442 = vsyncpa [#allocation6], 1 }

</bundles_post_ra>
